<compile_context>
chip_gen: v6e
topology: v6e:2x2x1
jax: 0.10.0
libtpu: 0.0.40
codegen_flags: <defaults>
</compile_context>

<pallas_src>
import functools

import jax
import jax.numpy as jnp
from jax.experimental import pallas as pl
from jax.experimental.pallas import tpu as pltpu


# -----------------------------------------------------------------------------
# Fused DecoderRNN forward kernel (one batch tile per grid step)
# -----------------------------------------------------------------------------
def decoder_kernel(emb_ref, feat_ref, w_emb_ref, w_img_ref, whh_ref,
                   b_gate_ref, w_lin_ref, b_lin_ref, h0_ref, c0_ref,
                   out_ref, hT_ref, cT_ref, xg_ref, hid_ref):
    """Shapes (per batch tile of size BT):
      emb_ref:    (Tm1, BT, E)    bf16  time-major token embeddings
      feat_ref:   (BT, 2*2048)    bf16  flattened raw image features
      w_emb_ref:  (E, 4H)         bf16  packed emb->gate weights (i,f,g,o)
      w_img_ref:  (2*2048, 4H)    bf16  W_proj composed with image part of W_ih
      whh_ref:    (H, 4H)         f32   packed recurrent weights
      b_gate_ref: (1, 4H)         f32   b_ih + b_hh + folded b_proj term
      w_lin_ref:  (H, V)          bf16  vocab projection
      b_lin_ref:  (1, V)          f32
      h0/c0:      (BT, H)         f32
      out_ref:    (BT, Tm1, V)    f32   logits, batch-major (no XLA transpose)
      hT/cT:      (BT, H)         f32   final LSTM state
      xg_ref:     (Tm1*BT, 4H)    f32   VMEM scratch: hoisted input projection
      hid_ref:    (Tm1*BT, H)     f32   VMEM scratch: per-step hidden states
    """
    BT, Tm1, V = out_ref.shape
    H = hT_ref.shape[1]
    H4 = 4 * H

    # ---- Prologue: hoisted, packed input projections (off the serial path).
    # Per-t matmuls keep all indexing tile-aligned without in-kernel reshapes.
    for t in range(Tm1):                                   # static loop
        xg_ref[t * BT:(t + 1) * BT, :] = jnp.dot(
            emb_ref[t], w_emb_ref[...], preferred_element_type=jnp.float32)

    # Time-constant image contribution (composed 2*2048 -> 4H) + gate bias.
    img_gate = (jnp.dot(feat_ref[...], w_img_ref[...],
                        preferred_element_type=jnp.float32)
                + b_gate_ref[...])                         # (BT, 4H)

    whh = whh_ref[...]                                     # (H, 4H) f32
    # Hoisted lane-gate mask: gate order i,f,g,o -> only g (lanes [2H,3H))
    # gets tanh; everything else sigmoid.  Computed once, reused every step.
    lane = jax.lax.broadcasted_iota(jnp.int32, (BT, H4), 1)
    is_g = (lane >= 2 * H) & (lane < 3 * H)

    # ---- Serial recurrence: only h @ W_hh (one lane-dense matmul) per step.
    def step(t, carry):
        h, c = carry
        row = pl.multiple_of(t * BT, BT)
        pre = (xg_ref[pl.ds(row, BT), :] + img_gate
               + jnp.dot(h, whh, preferred_element_type=jnp.float32))
        act = jnp.where(is_g, jnp.tanh(pre), jax.nn.sigmoid(pre))
        i_g = act[:, 0:H]
        f_g = act[:, H:2 * H]
        g_g = act[:, 2 * H:3 * H]
        o_g = act[:, 3 * H:4 * H]
        c = f_g * c + i_g * g_g
        h = o_g * jnp.tanh(c)
        hid_ref[pl.ds(row, BT), :] = h
        return (h, c)

    h, c = jax.lax.fori_loop(0, Tm1, step, (h0_ref[...], c0_ref[...]),
                             unroll=True)
    hT_ref[...] = h
    cT_ref[...] = c

    # ---- Epilogue: fused vocab projection on VMEM-resident hiddens; write
    #      logits batch-major so the wrapper needs no transpose / extra HBM IO.
    logits = (jnp.dot(hid_ref[...].astype(jnp.bfloat16), w_lin_ref[...],
                      preferred_element_type=jnp.float32)
              + b_lin_ref[...])                            # (Tm1*BT, V)
    for t in range(Tm1):                                   # static, aligned
        out_ref[:, pl.ds(t, 1), :] = (
            logits[t * BT:(t + 1) * BT, :].reshape(BT, 1, V))


# -----------------------------------------------------------------------------
# DecoderRNN forward (Pallas-backed wrapper)
# -----------------------------------------------------------------------------
def decoder_forward(params, features, captions, prev_hidden, *, batch_tile=8):
    """Mirrors DecoderRNN.forward.

    features:    (B, 2, 2048) f32
    captions:    (B, T) int32
    prev_hidden: tuple of (1, B, H) f32
    returns (outputs (B, T-1, V), (h (1,B,H), c (1,B,H)))
    """
    h0, c0 = prev_hidden
    B = features.shape[0]
    T = captions.shape[1]
    Tm1 = T - 1
    H = params["w_hh"].shape[1]
    V = params["w_lin"].shape[0]
    E = params["embed_w"].shape[1]
    VIS = params["w_proj"].shape[0]
    FEAT = params["w_proj"].shape[1]          # 2048
    VIS2 = 2 * VIS
    H4 = 4 * H

    BT = min(batch_tile, B)
    assert B % BT == 0, "batch must be divisible by the batch tile"
    nb = B // BT

    f32, bf16 = jnp.float32, jnp.bfloat16

    # ---- Packed / composed weights (gate order i,f,g,o along the 4H axis) --
    w_ih_t = params["w_ih"].T.astype(f32)                 # (2*VIS + E, 4H)
    wih_img = w_ih_t[:VIS2, :]                            # (2*VIS, 4H)
    w_emb = w_ih_t[VIS2:, :].astype(bf16)                 # (E, 4H)
    wp_t = params["w_proj"].T.astype(f32)                 # (2048, VIS)
    # features enter flattened as [slot0 | slot1]; compose W_proj with the
    # image columns of W_ih so the 16-lane image projection disappears and
    # the image term becomes one lane-dense prologue matmul.
    w_img = jnp.concatenate(
        [wp_t @ wih_img[:VIS, :], wp_t @ wih_img[VIS:, :]], axis=0
    ).astype(bf16)                                        # (2*2048, 4H)
    b_gate = (params["b_ih"] + params["b_hh"]
              + params["b_proj"] @ wih_img[:VIS, :]
              + params["b_proj"] @ wih_img[VIS:, :]).reshape(1, H4).astype(f32)
    whh = params["w_hh"].T.astype(f32)                    # (H, 4H), f32 recur.
    w_lin_t = params["w_lin"].T.astype(bf16)              # (H, V)
    b_lin = params["b_lin"].reshape(1, V).astype(f32)

    # ---- Activations -------------------------------------------------------
    # TODO(synk): embedding gather stays a plain XLA gather; a Pallas DMA
    # gather via PrefetchScalarGridSpec only pays off at large E / long T.
    emb3 = params["embed_w"][captions[:, :-1].T].astype(bf16)   # (Tm1, B, E)
    feat2 = features.reshape(B, 2 * FEAT).astype(bf16)          # (B, 2*2048)

    out, hT, cT = pl.pallas_call(
        decoder_kernel,
        out_shape=(
            jax.ShapeDtypeStruct((B, Tm1, V), f32),
            jax.ShapeDtypeStruct((B, H), f32),
            jax.ShapeDtypeStruct((B, H), f32),
        ),
        grid=(nb,),
        in_specs=[
            pl.BlockSpec((Tm1, BT, E), lambda i: (0, i, 0)),      # emb
            pl.BlockSpec((BT, 2 * FEAT), lambda i: (i, 0)),       # features
            pl.BlockSpec((E, H4), lambda i: (0, 0)),              # w_emb
            pl.BlockSpec((2 * FEAT, H4), lambda i: (0, 0)),       # w_img
            pl.BlockSpec((H, H4), lambda i: (0, 0)),              # whh
            pl.BlockSpec((1, H4), lambda i: (0, 0)),              # b_gate
            pl.BlockSpec((H, V), lambda i: (0, 0)),               # w_lin
            pl.BlockSpec((1, V), lambda i: (0, 0)),               # b_lin
            pl.BlockSpec((BT, H), lambda i: (i, 0)),              # h0
            pl.BlockSpec((BT, H), lambda i: (i, 0)),              # c0
        ],
        out_specs=(
            pl.BlockSpec((BT, Tm1, V), lambda i: (i, 0, 0)),      # logits
            pl.BlockSpec((BT, H), lambda i: (i, 0)),              # hT
            pl.BlockSpec((BT, H), lambda i: (i, 0)),              # cT
        ),
        scratch_shapes=[
            pltpu.VMEM((Tm1 * BT, H4), f32),   # hoisted input projection
            pltpu.VMEM((Tm1 * BT, H), f32),    # per-step hidden states
        ],
        compiler_params=pltpu.CompilerParams(
            dimension_semantics=("parallel",),
            vmem_limit_bytes=32 * 1024 * 1024),
    )(emb3, feat2, w_emb, w_img, whh, b_gate, w_lin_t, b_lin,
      h0[0].astype(f32), c0[0].astype(f32))

    return out, (hT[None], cT[None])


# -----------------------------------------------------------------------------
# Pure-JAX f32 reference (for correctness check)
# -----------------------------------------------------------------------------
def reference_forward(params, features, captions, prev_hidden):
    h0, c0 = prev_hidden
    B = features.shape[0]
    T = captions.shape[1]
    image_emb = features @ params["w_proj"].T + params["b_proj"]
    img_features = jnp.concatenate(
        [image_emb[:, 0, :], image_emb[:, 1, :]], axis=-1)
    emb = params["embed_w"][captions]
    img_rep = jnp.broadcast_to(
        img_features[:, None, :], (B, T - 1, img_features.shape[-1]))
    x = jnp.concatenate([img_rep, emb[:, :-1, :]], axis=-1)
    x_seq = jnp.transpose(x, (1, 0, 2))

    w_ih, w_hh = params["w_ih"], params["w_hh"]
    b_ih, b_hh = params["b_ih"], params["b_hh"]

    def step(carry, xt):
        h, c = carry
        gates = xt @ w_ih.T + b_ih + h @ w_hh.T + b_hh
        i, f, g, o = jnp.split(gates, 4, axis=-1)
        i, f, o = jax.nn.sigmoid(i), jax.nn.sigmoid(f), jax.nn.sigmoid(o)
        g = jnp.tanh(g)
        c = f * c + i * g
        h = o * jnp.tanh(c)
        return (h, c), h

    (hT, cT), hs = jax.lax.scan(step, (h0[0], c0[0]), x_seq)
    hiddens = jnp.transpose(hs, (1, 0, 2))
    outputs = hiddens @ params["w_lin"].T + params["b_lin"]
    return outputs, (hT[None], cT[None])


# -----------------------------------------------------------------------------
# Deterministic parameter construction (matches DecoderRNN.__init__ shapes)
# -----------------------------------------------------------------------------
def make_params(key, embed_size, hidden_size, vocab_size, visual_embed_size):
    d_in = embed_size + 2 * visual_embed_size
    ks = jax.random.split(key, 8)
    u = lambda k, shape, s: jax.random.uniform(
        k, shape, jnp.float32, minval=-s, maxval=s)
    lstm_s = 1.0 / (hidden_size ** 0.5)
    proj_s = 1.0 / (2048.0 ** 0.5)
    return {
        "embed_w": u(ks[0], (vocab_size, embed_size), 0.1),
        "w_proj": u(ks[1], (visual_embed_size, 2048), proj_s),
        "b_proj": u(ks[2], (visual_embed_size,), proj_s),
        "w_ih": u(ks[3], (4 * hidden_size, d_in), lstm_s),
        "w_hh": u(ks[4], (4 * hidden_size, hidden_size), lstm_s),
        "b_ih": u(ks[5], (4 * hidden_size,), lstm_s),
        "b_hh": u(ks[6], (4 * hidden_size,), lstm_s),
        "w_lin": u(ks[7], (vocab_size, hidden_size), 0.1),
        "b_lin": jnp.zeros((vocab_size,), jnp.float32),
    }


# -----------------------------------------------------------------------------
if __name__ == "__main__":
    EMBED, HIDDEN, VOCAB, VIS = 32, 32, 128, 16
    B, T = 8, 8

    key = jax.random.PRNGKey(0)
    kp, kf, kc, kh, kc2 = jax.random.split(key, 5)

    params = make_params(kp, EMBED, HIDDEN, VOCAB, VIS)

    features = jax.random.normal(kf, (B, 2, 2048), jnp.float32)
    captions = jax.random.randint(kc, (B, T), 0, VOCAB, jnp.int32)
    prev_hidden = (
        jax.random.normal(kh, (1, B, HIDDEN), jnp.float32),
        jax.random.normal(kc2, (1, B, HIDDEN), jnp.float32),
    )

    fwd = jax.jit(functools.partial(decoder_forward, params))
    outputs, (h_out, c_out) = fwd(features, captions, prev_hidden)
    jax.block_until_ready(outputs)
    jax.block_until_ready(h_out)
    jax.block_until_ready(c_out)

    # correctness check against the pure-f32 reference; tolerance loosened
    # because the big matmuls now run with bf16 MXU operands (f32 accumulate).
    ref_out, (ref_h, ref_c) = reference_forward(
        params, features, captions, prev_hidden)
    assert outputs.shape == (B, T - 1, VOCAB)
    assert h_out.shape == (1, B, HIDDEN) and c_out.shape == (1, B, HIDDEN)
    assert jnp.allclose(outputs, ref_out, atol=5e-2), "outputs mismatch"
    assert jnp.allclose(h_out, ref_h, atol=5e-2), "h mismatch"
    assert jnp.allclose(c_out, ref_c, atol=5e-2), "c mismatch"

    print("KERNEL_OK")
</pallas_src>

<mosaic_0001>
module attributes {stable_mosaic.version = 11 : i64} {
  func.func @decoder_kernel(%arg0: i32, %arg1: memref<7x8x32xbf16, #tpu.memory_space<vmem>>, %arg2: memref<8x4096xbf16, #tpu.memory_space<vmem>>, %arg3: memref<32x128xbf16, #tpu.memory_space<vmem>>, %arg4: memref<4096x128xbf16, #tpu.memory_space<vmem>>, %arg5: memref<32x128xf32, #tpu.memory_space<vmem>>, %arg6: memref<1x128xf32, #tpu.memory_space<vmem>>, %arg7: memref<32x128xbf16, #tpu.memory_space<vmem>>, %arg8: memref<1x128xf32, #tpu.memory_space<vmem>>, %arg9: memref<8x32xf32, #tpu.memory_space<vmem>>, %arg10: memref<8x32xf32, #tpu.memory_space<vmem>>, %arg11: memref<8x7x128xf32, #tpu.memory_space<vmem>>, %arg12: memref<8x32xf32, #tpu.memory_space<vmem>>, %arg13: memref<8x32xf32, #tpu.memory_space<vmem>>, %arg14: memref<56x128xf32, #tpu.memory_space<vmem>>, %arg15: memref<56x32xf32, #tpu.memory_space<vmem>>) attributes {dimension_semantics = [#tpu.dimension_semantics<parallel>], iteration_bounds = array<i64: 1>, scalar_prefetch = 0 : i64, scratch_operands = 2 : i64, tpu.core_type = #tpu.core_type<tc>, window_params = [{transform_indices = @transform_0, window_bounds = array<i64: 7, 8, 32>}, {transform_indices = @transform_1, window_bounds = array<i64: 8, 4096>}, {pipeline_mode = #tpu.pipeline_mode<synchronous>, transform_indices = @transform_2, window_bounds = array<i64: 32, 128>}, {pipeline_mode = #tpu.pipeline_mode<synchronous>, transform_indices = @transform_3, window_bounds = array<i64: 4096, 128>}, {pipeline_mode = #tpu.pipeline_mode<synchronous>, transform_indices = @transform_4, window_bounds = array<i64: 32, 128>}, {pipeline_mode = #tpu.pipeline_mode<synchronous>, transform_indices = @transform_5, window_bounds = array<i64: 1, 128>}, {pipeline_mode = #tpu.pipeline_mode<synchronous>, transform_indices = @transform_6, window_bounds = array<i64: 32, 128>}, {pipeline_mode = #tpu.pipeline_mode<synchronous>, transform_indices = @transform_7, window_bounds = array<i64: 1, 128>}, {transform_indices = @transform_8, window_bounds = array<i64: 8, 32>}, {transform_indices = @transform_9, window_bounds = array<i64: 8, 32>}, {transform_indices = @transform_10, window_bounds = array<i64: 8, 7, 128>}, {transform_indices = @transform_11, window_bounds = array<i64: 8, 32>}, {transform_indices = @transform_12, window_bounds = array<i64: 8, 32>}]} {
    %c0 = arith.constant 0 : index
    %c0_0 = arith.constant 0 : index
    %c0_1 = arith.constant 0 : index
    %0 = vector.load %arg1[%c0, %c0_0, %c0_1] : memref<7x8x32xbf16, #tpu.memory_space<vmem>>, vector<1x8x32xbf16>
    %1 = vector.shape_cast %0 : vector<1x8x32xbf16> to vector<8x32xbf16>
    %c0_2 = arith.constant 0 : index
    %c0_3 = arith.constant 0 : index
    %2 = vector.load %arg3[%c0_2, %c0_3] : memref<32x128xbf16, #tpu.memory_space<vmem>>, vector<32x128xbf16>
    %cst = arith.constant dense<0.000000e+00> : vector<8x128xf32>
    %3 = tpu.matmul %1, %2, %cst {dimension_numbers = #tpu.dot_dimension_numbers<[1], [0], [0], [1], [0, 0, 1, 1], [], []>} : vector<8x32xbf16>, vector<32x128xbf16>, vector<8x128xf32> -> vector<8x128xf32>
    %c0_4 = arith.constant 0 : index
    %c0_5 = arith.constant 0 : index
    %4 = vector.load %arg14[%c0_4, %c0_5] : memref<56x128xf32, #tpu.memory_space<vmem>>, vector<8x128xf32>
    tpu.vector_store %arg14[%c0_4, %c0_5], %3 {strides = array<i32>} : memref<56x128xf32, #tpu.memory_space<vmem>>, vector<8x128xf32>,
    %c1 = arith.constant 1 : index
    %c0_6 = arith.constant 0 : index
    %c0_7 = arith.constant 0 : index
    %5 = vector.load %arg1[%c1, %c0_6, %c0_7] : memref<7x8x32xbf16, #tpu.memory_space<vmem>>, vector<1x8x32xbf16>
    %6 = vector.shape_cast %5 : vector<1x8x32xbf16> to vector<8x32xbf16>
    %c0_8 = arith.constant 0 : index
    %c0_9 = arith.constant 0 : index
    %7 = vector.load %arg3[%c0_8, %c0_9] : memref<32x128xbf16, #tpu.memory_space<vmem>>, vector<32x128xbf16>
    %cst_10 = arith.constant dense<0.000000e+00> : vector<8x128xf32>
    %8 = tpu.matmul %6, %7, %cst_10 {dimension_numbers = #tpu.dot_dimension_numbers<[1], [0], [0], [1], [0, 0, 1, 1], [], []>} : vector<8x32xbf16>, vector<32x128xbf16>, vector<8x128xf32> -> vector<8x128xf32>
    %c8 = arith.constant 8 : index
    %c0_11 = arith.constant 0 : index
    %9 = vector.load %arg14[%c8, %c0_11] : memref<56x128xf32, #tpu.memory_space<vmem>>, vector<8x128xf32>
    tpu.vector_store %arg14[%c8, %c0_11], %8 {strides = array<i32>} : memref<56x128xf32, #tpu.memory_space<vmem>>, vector<8x128xf32>,
    %c2 = arith.constant 2 : index
    %c0_12 = arith.constant 0 : index
    %c0_13 = arith.constant 0 : index
    %10 = vector.load %arg1[%c2, %c0_12, %c0_13] : memref<7x8x32xbf16, #tpu.memory_space<vmem>>, vector<1x8x32xbf16>
    %11 = vector.shape_cast %10 : vector<1x8x32xbf16> to vector<8x32xbf16>
    %c0_14 = arith.constant 0 : index
    %c0_15 = arith.constant 0 : index
    %12 = vector.load %arg3[%c0_14, %c0_15] : memref<32x128xbf16, #tpu.memory_space<vmem>>, vector<32x128xbf16>
    %cst_16 = arith.constant dense<0.000000e+00> : vector<8x128xf32>
    %13 = tpu.matmul %11, %12, %cst_16 {dimension_numbers = #tpu.dot_dimension_numbers<[1], [0], [0], [1], [0, 0, 1, 1], [], []>} : vector<8x32xbf16>, vector<32x128xbf16>, vector<8x128xf32> -> vector<8x128xf32>
    %c16 = arith.constant 16 : index
    %c0_17 = arith.constant 0 : index
    %14 = vector.load %arg14[%c16, %c0_17] : memref<56x128xf32, #tpu.memory_space<vmem>>, vector<8x128xf32>
    tpu.vector_store %arg14[%c16, %c0_17], %13 {strides = array<i32>} : memref<56x128xf32, #tpu.memory_space<vmem>>, vector<8x128xf32>,
    %c3 = arith.constant 3 : index
    %c0_18 = arith.constant 0 : index
    %c0_19 = arith.constant 0 : index
    %15 = vector.load %arg1[%c3, %c0_18, %c0_19] : memref<7x8x32xbf16, #tpu.memory_space<vmem>>, vector<1x8x32xbf16>
    %16 = vector.shape_cast %15 : vector<1x8x32xbf16> to vector<8x32xbf16>
    %c0_20 = arith.constant 0 : index
    %c0_21 = arith.constant 0 : index
    %17 = vector.load %arg3[%c0_20, %c0_21] : memref<32x128xbf16, #tpu.memory_space<vmem>>, vector<32x128xbf16>
    %cst_22 = arith.constant dense<0.000000e+00> : vector<8x128xf32>
    %18 = tpu.matmul %16, %17, %cst_22 {dimension_numbers = #tpu.dot_dimension_numbers<[1], [0], [0], [1], [0, 0, 1, 1], [], []>} : vector<8x32xbf16>, vector<32x128xbf16>, vector<8x128xf32> -> vector<8x128xf32>
    %c24 = arith.constant 24 : index
    %c0_23 = arith.constant 0 : index
    %19 = vector.load %arg14[%c24, %c0_23] : memref<56x128xf32, #tpu.memory_space<vmem>>, vector<8x128xf32>
    tpu.vector_store %arg14[%c24, %c0_23], %18 {strides = array<i32>} : memref<56x128xf32, #tpu.memory_space<vmem>>, vector<8x128xf32>,
    %c4 = arith.constant 4 : index
    %c0_24 = arith.constant 0 : index
    %c0_25 = arith.constant 0 : index
    %20 = vector.load %arg1[%c4, %c0_24, %c0_25] : memref<7x8x32xbf16, #tpu.memory_space<vmem>>, vector<1x8x32xbf16>
    %21 = vector.shape_cast %20 : vector<1x8x32xbf16> to vector<8x32xbf16>
    %c0_26 = arith.constant 0 : index
    %c0_27 = arith.constant 0 : index
    %22 = vector.load %arg3[%c0_26, %c0_27] : memref<32x128xbf16, #tpu.memory_space<vmem>>, vector<32x128xbf16>
    %cst_28 = arith.constant dense<0.000000e+00> : vector<8x128xf32>
    %23 = tpu.matmul %21, %22, %cst_28 {dimension_numbers = #tpu.dot_dimension_numbers<[1], [0], [0], [1], [0, 0, 1, 1], [], []>} : vector<8x32xbf16>, vector<32x128xbf16>, vector<8x128xf32> -> vector<8x128xf32>
    %c32 = arith.constant 32 : index
    %c0_29 = arith.constant 0 : index
    %24 = vector.load %arg14[%c32, %c0_29] : memref<56x128xf32, #tpu.memory_space<vmem>>, vector<8x128xf32>
    tpu.vector_store %arg14[%c32, %c0_29], %23 {strides = array<i32>} : memref<56x128xf32, #tpu.memory_space<vmem>>, vector<8x128xf32>,
    %c5 = arith.constant 5 : index
    %c0_30 = arith.constant 0 : index
    %c0_31 = arith.constant 0 : index
    %25 = vector.load %arg1[%c5, %c0_30, %c0_31] : memref<7x8x32xbf16, #tpu.memory_space<vmem>>, vector<1x8x32xbf16>
    %26 = vector.shape_cast %25 : vector<1x8x32xbf16> to vector<8x32xbf16>
    %c0_32 = arith.constant 0 : index
    %c0_33 = arith.constant 0 : index
    %27 = vector.load %arg3[%c0_32, %c0_33] : memref<32x128xbf16, #tpu.memory_space<vmem>>, vector<32x128xbf16>
    %cst_34 = arith.constant dense<0.000000e+00> : vector<8x128xf32>
    %28 = tpu.matmul %26, %27, %cst_34 {dimension_numbers = #tpu.dot_dimension_numbers<[1], [0], [0], [1], [0, 0, 1, 1], [], []>} : vector<8x32xbf16>, vector<32x128xbf16>, vector<8x128xf32> -> vector<8x128xf32>
    %c40 = arith.constant 40 : index
    %c0_35 = arith.constant 0 : index
    %29 = vector.load %arg14[%c40, %c0_35] : memref<56x128xf32, #tpu.memory_space<vmem>>, vector<8x128xf32>
    tpu.vector_store %arg14[%c40, %c0_35], %28 {strides = array<i32>} : memref<56x128xf32, #tpu.memory_space<vmem>>, vector<8x128xf32>,
    %c6 = arith.constant 6 : index
    %c0_36 = arith.constant 0 : index
    %c0_37 = arith.constant 0 : index
    %30 = vector.load %arg1[%c6, %c0_36, %c0_37] : memref<7x8x32xbf16, #tpu.memory_space<vmem>>, vector<1x8x32xbf16>
    %31 = vector.shape_cast %30 : vector<1x8x32xbf16> to vector<8x32xbf16>
    %c0_38 = arith.constant 0 : index
    %c0_39 = arith.constant 0 : index
    %32 = vector.load %arg3[%c0_38, %c0_39] : memref<32x128xbf16, #tpu.memory_space<vmem>>, vector<32x128xbf16>
    %cst_40 = arith.constant dense<0.000000e+00> : vector<8x128xf32>
    %33 = tpu.matmul %31, %32, %cst_40 {dimension_numbers = #tpu.dot_dimension_numbers<[1], [0], [0], [1], [0, 0, 1, 1], [], []>} : vector<8x32xbf16>, vector<32x128xbf16>, vector<8x128xf32> -> vector<8x128xf32>
    %c48 = arith.constant 48 : index
    %c0_41 = arith.constant 0 : index
    %34 = vector.load %arg14[%c48, %c0_41] : memref<56x128xf32, #tpu.memory_space<vmem>>, vector<8x128xf32>
    tpu.vector_store %arg14[%c48, %c0_41], %33 {strides = array<i32>} : memref<56x128xf32, #tpu.memory_space<vmem>>, vector<8x128xf32>,
    %c0_42 = arith.constant 0 : index
    %c0_43 = arith.constant 0 : index
    %35 = vector.load %arg2[%c0_42, %c0_43] : memref<8x4096xbf16, #tpu.memory_space<vmem>>, vector<8x4096xbf16>
    %c0_44 = arith.constant 0 : index
    %c0_45 = arith.constant 0 : index
    %36 = vector.load %arg4[%c0_44, %c0_45] : memref<4096x128xbf16, #tpu.memory_space<vmem>>, vector<4096x128xbf16>
    %cst_46 = arith.constant dense<0.000000e+00> : vector<8x128xf32>
    %37 = tpu.matmul %35, %36, %cst_46 {dimension_numbers = #tpu.dot_dimension_numbers<[1], [0], [0], [1], [0, 0, 1, 1], [], []>} : vector<8x4096xbf16>, vector<4096x128xbf16>, vector<8x128xf32> -> vector<8x128xf32>
    %c0_47 = arith.constant 0 : index
    %c0_48 = arith.constant 0 : index
    %38 = vector.load %arg6[%c0_47, %c0_48] : memref<1x128xf32, #tpu.memory_space<vmem>>, vector<1x128xf32>
    %39 = vector.broadcast %38 : vector<1x128xf32> to vector<8x128xf32>
    %40 = arith.addf %37, %39 : vector<8x128xf32>
    %c0_49 = arith.constant 0 : index
    %c0_50 = arith.constant 0 : index
    %41 = vector.load %arg5[%c0_49, %c0_50] : memref<32x128xf32, #tpu.memory_space<vmem>>, vector<32x128xf32>
    %42 = tpu.iota {dimensions = array<i32: 1>} : vector<8x128xi32>
    %c64_i32 = arith.constant 64 : i32
    %43 = vector.broadcast %c64_i32 : i32 to vector<8x128xi32>
    %44 = arith.cmpi sge, %42, %43 : vector<8x128xi32>
    %c96_i32 = arith.constant 96 : i32
    %45 = vector.broadcast %c96_i32 : i32 to vector<8x128xi32>
    %46 = arith.cmpi slt, %42, %45 : vector<8x128xi32>
    %47 = arith.andi %44, %46 : vector<8x128xi1>
    %c0_51 = arith.constant 0 : index
    %c0_52 = arith.constant 0 : index
    %48 = vector.load %arg9[%c0_51, %c0_52] : memref<8x32xf32, #tpu.memory_space<vmem>>, vector<8x32xf32>
    %c0_53 = arith.constant 0 : index
    %c0_54 = arith.constant 0 : index
    %49 = vector.load %arg10[%c0_53, %c0_54] : memref<8x32xf32, #tpu.memory_space<vmem>>, vector<8x32xf32>
    %c0_i32 = arith.constant 0 : i32
    %c8_i32 = arith.constant 8 : i32
    %50 = arith.muli %c0_i32, %c8_i32 : i32
    %51 = tpu.assume_multiple %50, 8 : i32
    %52 = arith.index_cast %51 : i32 to index
    %c0_55 = arith.constant 0 : index
    %53 = vector.load %arg14[%52, %c0_55] : memref<56x128xf32, #tpu.memory_space<vmem>>, vector<8x128xf32>
    %54 = arith.addf %53, %40 : vector<8x128xf32>
    %cst_56 = arith.constant dense<0.000000e+00> : vector<8x128xf32>
    %55 = tpu.matmul %48, %41, %cst_56 {dimension_numbers = #tpu.dot_dimension_numbers<[1], [0], [0], [1], [0, 0, 1, 1], [], []>} : vector<8x32xf32>, vector<32x128xf32>, vector<8x128xf32> -> vector<8x128xf32>
    %56 = arith.addf %54, %55 : vector<8x128xf32>
    %57 = math.tanh %56 : vector<8x128xf32>
    %58 = arith.negf %56 : vector<8x128xf32>
    %59 = math.exp %58 : vector<8x128xf32>
    %cst_57 = arith.constant 1.000000e+00 : f32
    %60 = vector.broadcast %cst_57 : f32 to vector<8x128xf32>
    %61 = arith.addf %60, %59 : vector<8x128xf32>
    %62 = arith.divf %60, %61 : vector<8x128xf32>
    %63 = arith.select %47, %57, %62 : vector<8x128xi1>, vector<8x128xf32>
    %64 = vector.extract_strided_slice %63 {offsets = [0, 0], sizes = [8, 32], strides = [1, 1]} : vector<8x128xf32> to vector<8x32xf32>
    %65 = vector.extract_strided_slice %63 {offsets = [0, 32], sizes = [8, 32], strides = [1, 1]} : vector<8x128xf32> to vector<8x32xf32>
    %66 = vector.extract_strided_slice %63 {offsets = [0, 64], sizes = [8, 32], strides = [1, 1]} : vector<8x128xf32> to vector<8x32xf32>
    %67 = vector.extract_strided_slice %63 {offsets = [0, 96], sizes = [8, 32], strides = [1, 1]} : vector<8x128xf32> to vector<8x32xf32>
    %68 = arith.mulf %65, %49 : vector<8x32xf32>
    %69 = arith.mulf %64, %66 : vector<8x32xf32>
    %70 = arith.addf %68, %69 : vector<8x32xf32>
    %71 = math.tanh %70 : vector<8x32xf32>
    %72 = arith.mulf %67, %71 : vector<8x32xf32>
    %73 = arith.index_cast %51 : i32 to index
    %c0_58 = arith.constant 0 : index
    %74 = vector.load %arg15[%73, %c0_58] : memref<56x32xf32, #tpu.memory_space<vmem>>, vector<8x32xf32>
    tpu.vector_store %arg15[%73, %c0_58], %72 {strides = array<i32>} : memref<56x32xf32, #tpu.memory_space<vmem>>, vector<8x32xf32>,
    %c1_i32 = arith.constant 1 : i32
    %c8_i32_59 = arith.constant 8 : i32
    %75 = arith.muli %c1_i32, %c8_i32_59 : i32
    %76 = tpu.assume_multiple %75, 8 : i32
    %77 = arith.index_cast %76 : i32 to index
    %c0_60 = arith.constant 0 : index
    %78 = vector.load %arg14[%77, %c0_60] : memref<56x128xf32, #tpu.memory_space<vmem>>, vector<8x128xf32>
    %79 = arith.addf %78, %40 : vector<8x128xf32>
    %cst_61 = arith.constant dense<0.000000e+00> : vector<8x128xf32>
    %80 = tpu.matmul %72, %41, %cst_61 {dimension_numbers = #tpu.dot_dimension_numbers<[1], [0], [0], [1], [0, 0, 1, 1], [], []>} : vector<8x32xf32>, vector<32x128xf32>, vector<8x128xf32> -> vector<8x128xf32>
    %81 = arith.addf %79, %80 : vector<8x128xf32>
    %82 = math.tanh %81 : vector<8x128xf32>
    %83 = arith.negf %81 : vector<8x128xf32>
    %84 = math.exp %83 : vector<8x128xf32>
    %cst_62 = arith.constant 1.000000e+00 : f32
    %85 = vector.broadcast %cst_62 : f32 to vector<8x128xf32>
    %86 = arith.addf %85, %84 : vector<8x128xf32>
    %87 = arith.divf %85, %86 : vector<8x128xf32>
    %88 = arith.select %47, %82, %87 : vector<8x128xi1>, vector<8x128xf32>
    %89 = vector.extract_strided_slice %88 {offsets = [0, 0], sizes = [8, 32], strides = [1, 1]} : vector<8x128xf32> to vector<8x32xf32>
    %90 = vector.extract_strided_slice %88 {offsets = [0, 32], sizes = [8, 32], strides = [1, 1]} : vector<8x128xf32> to vector<8x32xf32>
    %91 = vector.extract_strided_slice %88 {offsets = [0, 64], sizes = [8, 32], strides = [1, 1]} : vector<8x128xf32> to vector<8x32xf32>
    %92 = vector.extract_strided_slice %88 {offsets = [0, 96], sizes = [8, 32], strides = [1, 1]} : vector<8x128xf32> to vector<8x32xf32>
    %93 = arith.mulf %90, %70 : vector<8x32xf32>
    %94 = arith.mulf %89, %91 : vector<8x32xf32>
    %95 = arith.addf %93, %94 : vector<8x32xf32>
    %96 = math.tanh %95 : vector<8x32xf32>
    %97 = arith.mulf %92, %96 : vector<8x32xf32>
    %98 = arith.index_cast %76 : i32 to index
    %c0_63 = arith.constant 0 : index
    %99 = vector.load %arg15[%98, %c0_63] : memref<56x32xf32, #tpu.memory_space<vmem>>, vector<8x32xf32>
    tpu.vector_store %arg15[%98, %c0_63], %97 {strides = array<i32>} : memref<56x32xf32, #tpu.memory_space<vmem>>, vector<8x32xf32>,
    %c2_i32 = arith.constant 2 : i32
    %c8_i32_64 = arith.constant 8 : i32
    %100 = arith.muli %c2_i32, %c8_i32_64 : i32
    %101 = tpu.assume_multiple %100, 8 : i32
    %102 = arith.index_cast %101 : i32 to index
    %c0_65 = arith.constant 0 : index
    %103 = vector.load %arg14[%102, %c0_65] : memref<56x128xf32, #tpu.memory_space<vmem>>, vector<8x128xf32>
    %104 = arith.addf %103, %40 : vector<8x128xf32>
    %cst_66 = arith.constant dense<0.000000e+00> : vector<8x128xf32>
    %105 = tpu.matmul %97, %41, %cst_66 {dimension_numbers = #tpu.dot_dimension_numbers<[1], [0], [0], [1], [0, 0, 1, 1], [], []>} : vector<8x32xf32>, vector<32x128xf32>, vector<8x128xf32> -> vector<8x128xf32>
    %106 = arith.addf %104, %105 : vector<8x128xf32>
    %107 = math.tanh %106 : vector<8x128xf32>
    %108 = arith.negf %106 : vector<8x128xf32>
    %109 = math.exp %108 : vector<8x128xf32>
    %cst_67 = arith.constant 1.000000e+00 : f32
    %110 = vector.broadcast %cst_67 : f32 to vector<8x128xf32>
    %111 = arith.addf %110, %109 : vector<8x128xf32>
    %112 = arith.divf %110, %111 : vector<8x128xf32>
    %113 = arith.select %47, %107, %112 : vector<8x128xi1>, vector<8x128xf32>
    %114 = vector.extract_strided_slice %113 {offsets = [0, 0], sizes = [8, 32], strides = [1, 1]} : vector<8x128xf32> to vector<8x32xf32>
    %115 = vector.extract_strided_slice %113 {offsets = [0, 32], sizes = [8, 32], strides = [1, 1]} : vector<8x128xf32> to vector<8x32xf32>
    %116 = vector.extract_strided_slice %113 {offsets = [0, 64], sizes = [8, 32], strides = [1, 1]} : vector<8x128xf32> to vector<8x32xf32>
    %117 = vector.extract_strided_slice %113 {offsets = [0, 96], sizes = [8, 32], strides = [1, 1]} : vector<8x128xf32> to vector<8x32xf32>
    %118 = arith.mulf %115, %95 : vector<8x32xf32>
    %119 = arith.mulf %114, %116 : vector<8x32xf32>
    %120 = arith.addf %118, %119 : vector<8x32xf32>
    %121 = math.tanh %120 : vector<8x32xf32>
    %122 = arith.mulf %117, %121 : vector<8x32xf32>
    %123 = arith.index_cast %101 : i32 to index
    %c0_68 = arith.constant 0 : index
    %124 = vector.load %arg15[%123, %c0_68] : memref<56x32xf32, #tpu.memory_space<vmem>>, vector<8x32xf32>
    tpu.vector_store %arg15[%123, %c0_68], %122 {strides = array<i32>} : memref<56x32xf32, #tpu.memory_space<vmem>>, vector<8x32xf32>,
    %c3_i32 = arith.constant 3 : i32
    %c8_i32_69 = arith.constant 8 : i32
    %125 = arith.muli %c3_i32, %c8_i32_69 : i32
    %126 = tpu.assume_multiple %125, 8 : i32
    %127 = arith.index_cast %126 : i32 to index
    %c0_70 = arith.constant 0 : index
    %128 = vector.load %arg14[%127, %c0_70] : memref<56x128xf32, #tpu.memory_space<vmem>>, vector<8x128xf32>
    %129 = arith.addf %128, %40 : vector<8x128xf32>
    %cst_71 = arith.constant dense<0.000000e+00> : vector<8x128xf32>
    %130 = tpu.matmul %122, %41, %cst_71 {dimension_numbers = #tpu.dot_dimension_numbers<[1], [0], [0], [1], [0, 0, 1, 1], [], []>} : vector<8x32xf32>, vector<32x128xf32>, vector<8x128xf32> -> vector<8x128xf32>
    %131 = arith.addf %129, %130 : vector<8x128xf32>
    %132 = math.tanh %131 : vector<8x128xf32>
    %133 = arith.negf %131 : vector<8x128xf32>
    %134 = math.exp %133 : vector<8x128xf32>
    %cst_72 = arith.constant 1.000000e+00 : f32
    %135 = vector.broadcast %cst_72 : f32 to vector<8x128xf32>
    %136 = arith.addf %135, %134 : vector<8x128xf32>
    %137 = arith.divf %135, %136 : vector<8x128xf32>
    %138 = arith.select %47, %132, %137 : vector<8x128xi1>, vector<8x128xf32>
    %139 = vector.extract_strided_slice %138 {offsets = [0, 0], sizes = [8, 32], strides = [1, 1]} : vector<8x128xf32> to vector<8x32xf32>
    %140 = vector.extract_strided_slice %138 {offsets = [0, 32], sizes = [8, 32], strides = [1, 1]} : vector<8x128xf32> to vector<8x32xf32>
    %141 = vector.extract_strided_slice %138 {offsets = [0, 64], sizes = [8, 32], strides = [1, 1]} : vector<8x128xf32> to vector<8x32xf32>
    %142 = vector.extract_strided_slice %138 {offsets = [0, 96], sizes = [8, 32], strides = [1, 1]} : vector<8x128xf32> to vector<8x32xf32>
    %143 = arith.mulf %140, %120 : vector<8x32xf32>
    %144 = arith.mulf %139, %141 : vector<8x32xf32>
    %145 = arith.addf %143, %144 : vector<8x32xf32>
    %146 = math.tanh %145 : vector<8x32xf32>
    %147 = arith.mulf %142, %146 : vector<8x32xf32>
    %148 = arith.index_cast %126 : i32 to index
    %c0_73 = arith.constant 0 : index
    %149 = vector.load %arg15[%148, %c0_73] : memref<56x32xf32, #tpu.memory_space<vmem>>, vector<8x32xf32>
    tpu.vector_store %arg15[%148, %c0_73], %147 {strides = array<i32>} : memref<56x32xf32, #tpu.memory_space<vmem>>, vector<8x32xf32>,
    %c4_i32 = arith.constant 4 : i32
    %c8_i32_74 = arith.constant 8 : i32
    %150 = arith.muli %c4_i32, %c8_i32_74 : i32
    %151 = tpu.assume_multiple %150, 8 : i32
    %152 = arith.index_cast %151 : i32 to index
    %c0_75 = arith.constant 0 : index
    %153 = vector.load %arg14[%152, %c0_75] : memref<56x128xf32, #tpu.memory_space<vmem>>, vector<8x128xf32>
    %154 = arith.addf %153, %40 : vector<8x128xf32>
    %cst_76 = arith.constant dense<0.000000e+00> : vector<8x128xf32>
    %155 = tpu.matmul %147, %41, %cst_76 {dimension_numbers = #tpu.dot_dimension_numbers<[1], [0], [0], [1], [0, 0, 1, 1], [], []>} : vector<8x32xf32>, vector<32x128xf32>, vector<8x128xf32> -> vector<8x128xf32>
    %156 = arith.addf %154, %155 : vector<8x128xf32>
    %157 = math.tanh %156 : vector<8x128xf32>
    %158 = arith.negf %156 : vector<8x128xf32>
    %159 = math.exp %158 : vector<8x128xf32>
    %cst_77 = arith.constant 1.000000e+00 : f32
    %160 = vector.broadcast %cst_77 : f32 to vector<8x128xf32>
    %161 = arith.addf %160, %159 : vector<8x128xf32>
    %162 = arith.divf %160, %161 : vector<8x128xf32>
    %163 = arith.select %47, %157, %162 : vector<8x128xi1>, vector<8x128xf32>
    %164 = vector.extract_strided_slice %163 {offsets = [0, 0], sizes = [8, 32], strides = [1, 1]} : vector<8x128xf32> to vector<8x32xf32>
    %165 = vector.extract_strided_slice %163 {offsets = [0, 32], sizes = [8, 32], strides = [1, 1]} : vector<8x128xf32> to vector<8x32xf32>
    %166 = vector.extract_strided_slice %163 {offsets = [0, 64], sizes = [8, 32], strides = [1, 1]} : vector<8x128xf32> to vector<8x32xf32>
    %167 = vector.extract_strided_slice %163 {offsets = [0, 96], sizes = [8, 32], strides = [1, 1]} : vector<8x128xf32> to vector<8x32xf32>
    %168 = arith.mulf %165, %145 : vector<8x32xf32>
    %169 = arith.mulf %164, %166 : vector<8x32xf32>
    %170 = arith.addf %168, %169 : vector<8x32xf32>
    %171 = math.tanh %170 : vector<8x32xf32>
    %172 = arith.mulf %167, %171 : vector<8x32xf32>
    %173 = arith.index_cast %151 : i32 to index
    %c0_78 = arith.constant 0 : index
    %174 = vector.load %arg15[%173, %c0_78] : memref<56x32xf32, #tpu.memory_space<vmem>>, vector<8x32xf32>
    tpu.vector_store %arg15[%173, %c0_78], %172 {strides = array<i32>} : memref<56x32xf32, #tpu.memory_space<vmem>>, vector<8x32xf32>,
    %c5_i32 = arith.constant 5 : i32
    %c8_i32_79 = arith.constant 8 : i32
    %175 = arith.muli %c5_i32, %c8_i32_79 : i32
    %176 = tpu.assume_multiple %175, 8 : i32
    %177 = arith.index_cast %176 : i32 to index
    %c0_80 = arith.constant 0 : index
    %178 = vector.load %arg14[%177, %c0_80] : memref<56x128xf32, #tpu.memory_space<vmem>>, vector<8x128xf32>
    %179 = arith.addf %178, %40 : vector<8x128xf32>
    %cst_81 = arith.constant dense<0.000000e+00> : vector<8x128xf32>
    %180 = tpu.matmul %172, %41, %cst_81 {dimension_numbers = #tpu.dot_dimension_numbers<[1], [0], [0], [1], [0, 0, 1, 1], [], []>} : vector<8x32xf32>, vector<32x128xf32>, vector<8x128xf32> -> vector<8x128xf32>
    %181 = arith.addf %179, %180 : vector<8x128xf32>
    %182 = math.tanh %181 : vector<8x128xf32>
    %183 = arith.negf %181 : vector<8x128xf32>
    %184 = math.exp %183 : vector<8x128xf32>
    %cst_82 = arith.constant 1.000000e+00 : f32
    %185 = vector.broadcast %cst_82 : f32 to vector<8x128xf32>
    %186 = arith.addf %185, %184 : vector<8x128xf32>
    %187 = arith.divf %185, %186 : vector<8x128xf32>
    %188 = arith.select %47, %182, %187 : vector<8x128xi1>, vector<8x128xf32>
    %189 = vector.extract_strided_slice %188 {offsets = [0, 0], sizes = [8, 32], strides = [1, 1]} : vector<8x128xf32> to vector<8x32xf32>
    %190 = vector.extract_strided_slice %188 {offsets = [0, 32], sizes = [8, 32], strides = [1, 1]} : vector<8x128xf32> to vector<8x32xf32>
    %191 = vector.extract_strided_slice %188 {offsets = [0, 64], sizes = [8, 32], strides = [1, 1]} : vector<8x128xf32> to vector<8x32xf32>
    %192 = vector.extract_strided_slice %188 {offsets = [0, 96], sizes = [8, 32], strides = [1, 1]} : vector<8x128xf32> to vector<8x32xf32>
    %193 = arith.mulf %190, %170 : vector<8x32xf32>
    %194 = arith.mulf %189, %191 : vector<8x32xf32>
    %195 = arith.addf %193, %194 : vector<8x32xf32>
    %196 = math.tanh %195 : vector<8x32xf32>
    %197 = arith.mulf %192, %196 : vector<8x32xf32>
    %198 = arith.index_cast %176 : i32 to index
    %c0_83 = arith.constant 0 : index
    %199 = vector.load %arg15[%198, %c0_83] : memref<56x32xf32, #tpu.memory_space<vmem>>, vector<8x32xf32>
    tpu.vector_store %arg15[%198, %c0_83], %197 {strides = array<i32>} : memref<56x32xf32, #tpu.memory_space<vmem>>, vector<8x32xf32>,
    %c6_i32 = arith.constant 6 : i32
    %c8_i32_84 = arith.constant 8 : i32
    %200 = arith.muli %c6_i32, %c8_i32_84 : i32
    %201 = tpu.assume_multiple %200, 8 : i32
    %202 = arith.index_cast %201 : i32 to index
    %c0_85 = arith.constant 0 : index
    %203 = vector.load %arg14[%202, %c0_85] : memref<56x128xf32, #tpu.memory_space<vmem>>, vector<8x128xf32>
    %204 = arith.addf %203, %40 : vector<8x128xf32>
    %cst_86 = arith.constant dense<0.000000e+00> : vector<8x128xf32>
    %205 = tpu.matmul %197, %41, %cst_86 {dimension_numbers = #tpu.dot_dimension_numbers<[1], [0], [0], [1], [0, 0, 1, 1], [], []>} : vector<8x32xf32>, vector<32x128xf32>, vector<8x128xf32> -> vector<8x128xf32>
    %206 = arith.addf %204, %205 : vector<8x128xf32>
    %207 = math.tanh %206 : vector<8x128xf32>
    %208 = arith.negf %206 : vector<8x128xf32>
    %209 = math.exp %208 : vector<8x128xf32>
    %cst_87 = arith.constant 1.000000e+00 : f32
    %210 = vector.broadcast %cst_87 : f32 to vector<8x128xf32>
    %211 = arith.addf %210, %209 : vector<8x128xf32>
    %212 = arith.divf %210, %211 : vector<8x128xf32>
    %213 = arith.select %47, %207, %212 : vector<8x128xi1>, vector<8x128xf32>
    %214 = vector.extract_strided_slice %213 {offsets = [0, 0], sizes = [8, 32], strides = [1, 1]} : vector<8x128xf32> to vector<8x32xf32>
    %215 = vector.extract_strided_slice %213 {offsets = [0, 32], sizes = [8, 32], strides = [1, 1]} : vector<8x128xf32> to vector<8x32xf32>
    %216 = vector.extract_strided_slice %213 {offsets = [0, 64], sizes = [8, 32], strides = [1, 1]} : vector<8x128xf32> to vector<8x32xf32>
    %217 = vector.extract_strided_slice %213 {offsets = [0, 96], sizes = [8, 32], strides = [1, 1]} : vector<8x128xf32> to vector<8x32xf32>
    %218 = arith.mulf %215, %195 : vector<8x32xf32>
    %219 = arith.mulf %214, %216 : vector<8x32xf32>
    %220 = arith.addf %218, %219 : vector<8x32xf32>
    %221 = math.tanh %220 : vector<8x32xf32>
    %222 = arith.mulf %217, %221 : vector<8x32xf32>
    %223 = arith.index_cast %201 : i32 to index
    %c0_88 = arith.constant 0 : index
    %224 = vector.load %arg15[%223, %c0_88] : memref<56x32xf32, #tpu.memory_space<vmem>>, vector<8x32xf32>
    tpu.vector_store %arg15[%223, %c0_88], %222 {strides = array<i32>} : memref<56x32xf32, #tpu.memory_space<vmem>>, vector<8x32xf32>,
    %c7_i32 = arith.constant 7 : i32
    %c0_89 = arith.constant 0 : index
    %c0_90 = arith.constant 0 : index
    %225 = vector.load %arg12[%c0_89, %c0_90] : memref<8x32xf32, #tpu.memory_space<vmem>>, vector<8x32xf32>
    tpu.vector_store %arg12[%c0_89, %c0_90], %222 {strides = array<i32>} : memref<8x32xf32, #tpu.memory_space<vmem>>, vector<8x32xf32>,
    %c0_91 = arith.constant 0 : index
    %c0_92 = arith.constant 0 : index
    %226 = vector.load %arg13[%c0_91, %c0_92] : memref<8x32xf32, #tpu.memory_space<vmem>>, vector<8x32xf32>
    tpu.vector_store %arg13[%c0_91, %c0_92], %220 {strides = array<i32>} : memref<8x32xf32, #tpu.memory_space<vmem>>, vector<8x32xf32>,
    %c0_93 = arith.constant 0 : index
    %c0_94 = arith.constant 0 : index
    %227 = vector.load %arg15[%c0_93, %c0_94] : memref<56x32xf32, #tpu.memory_space<vmem>>, vector<56x32xf32>
    %228 = arith.truncf %227 : vector<56x32xf32> to vector<56x32xbf16>
    %c0_95 = arith.constant 0 : index
    %c0_96 = arith.constant 0 : index
    %229 = vector.load %arg7[%c0_95, %c0_96] : memref<32x128xbf16, #tpu.memory_space<vmem>>, vector<32x128xbf16>
    %cst_97 = arith.constant dense<0.000000e+00> : vector<56x128xf32>
    %230 = tpu.matmul %228, %229, %cst_97 {dimension_numbers = #tpu.dot_dimension_numbers<[1], [0], [0], [1], [0, 0, 1, 1], [], []>} : vector<56x32xbf16>, vector<32x128xbf16>, vector<56x128xf32> -> vector<56x128xf32>
    %c0_98 = arith.constant 0 : index
    %c0_99 = arith.constant 0 : index
    %231 = vector.load %arg8[%c0_98, %c0_99] : memref<1x128xf32, #tpu.memory_space<vmem>>, vector<1x128xf32>
    %232 = vector.broadcast %231 : vector<1x128xf32> to vector<56x128xf32>
    %233 = arith.addf %230, %232 : vector<56x128xf32>
    %234 = vector.extract_strided_slice %233 {offsets = [0, 0], sizes = [8, 128], strides = [1, 1]} : vector<56x128xf32> to vector<8x128xf32>
    %235 = vector.shape_cast %234 : vector<8x128xf32> to vector<8x1x128xf32>
    %c0_100 = arith.constant 0 : index
    %c0_101 = arith.constant 0 : index
    %c0_102 = arith.constant 0 : index
    %236 = vector.load %arg11[%c0_100, %c0_101, %c0_102] : memref<8x7x128xf32, #tpu.memory_space<vmem>>, vector<8x1x128xf32>
    tpu.vector_store %arg11[%c0_100, %c0_101, %c0_102], %235 {strides = array<i32>} : memref<8x7x128xf32, #tpu.memory_space<vmem>>, vector<8x1x128xf32>,
    %237 = vector.extract_strided_slice %233 {offsets = [8, 0], sizes = [8, 128], strides = [1, 1]} : vector<56x128xf32> to vector<8x128xf32>
    %238 = vector.shape_cast %237 : vector<8x128xf32> to vector<8x1x128xf32>
    %c0_103 = arith.constant 0 : index
    %c1_104 = arith.constant 1 : index
    %c0_105 = arith.constant 0 : index
    %239 = vector.load %arg11[%c0_103, %c1_104, %c0_105] : memref<8x7x128xf32, #tpu.memory_space<vmem>>, vector<8x1x128xf32>
    tpu.vector_store %arg11[%c0_103, %c1_104, %c0_105], %238 {strides = array<i32>} : memref<8x7x128xf32, #tpu.memory_space<vmem>>, vector<8x1x128xf32>,
    %240 = vector.extract_strided_slice %233 {offsets = [16, 0], sizes = [8, 128], strides = [1, 1]} : vector<56x128xf32> to vector<8x128xf32>
    %241 = vector.shape_cast %240 : vector<8x128xf32> to vector<8x1x128xf32>
    %c0_106 = arith.constant 0 : index
    %c2_107 = arith.constant 2 : index
    %c0_108 = arith.constant 0 : index
    %242 = vector.load %arg11[%c0_106, %c2_107, %c0_108] : memref<8x7x128xf32, #tpu.memory_space<vmem>>, vector<8x1x128xf32>
    tpu.vector_store %arg11[%c0_106, %c2_107, %c0_108], %241 {strides = array<i32>} : memref<8x7x128xf32, #tpu.memory_space<vmem>>, vector<8x1x128xf32>,
    %243 = vector.extract_strided_slice %233 {offsets = [24, 0], sizes = [8, 128], strides = [1, 1]} : vector<56x128xf32> to vector<8x128xf32>
    %244 = vector.shape_cast %243 : vector<8x128xf32> to vector<8x1x128xf32>
    %c0_109 = arith.constant 0 : index
    %c3_110 = arith.constant 3 : index
    %c0_111 = arith.constant 0 : index
    %245 = vector.load %arg11[%c0_109, %c3_110, %c0_111] : memref<8x7x128xf32, #tpu.memory_space<vmem>>, vector<8x1x128xf32>
    tpu.vector_store %arg11[%c0_109, %c3_110, %c0_111], %244 {strides = array<i32>} : memref<8x7x128xf32, #tpu.memory_space<vmem>>, vector<8x1x128xf32>,
    %246 = vector.extract_strided_slice %233 {offsets = [32, 0], sizes = [8, 128], strides = [1, 1]} : vector<56x128xf32> to vector<8x128xf32>
    %247 = vector.shape_cast %246 : vector<8x128xf32> to vector<8x1x128xf32>
    %c0_112 = arith.constant 0 : index
    %c4_113 = arith.constant 4 : index
    %c0_114 = arith.constant 0 : index
    %248 = vector.load %arg11[%c0_112, %c4_113, %c0_114] : memref<8x7x128xf32, #tpu.memory_space<vmem>>, vector<8x1x128xf32>
    tpu.vector_store %arg11[%c0_112, %c4_113, %c0_114], %247 {strides = array<i32>} : memref<8x7x128xf32, #tpu.memory_space<vmem>>, vector<8x1x128xf32>,
    %249 = vector.extract_strided_slice %233 {offsets = [40, 0], sizes = [8, 128], strides = [1, 1]} : vector<56x128xf32> to vector<8x128xf32>
    %250 = vector.shape_cast %249 : vector<8x128xf32> to vector<8x1x128xf32>
    %c0_115 = arith.constant 0 : index
    %c5_116 = arith.constant 5 : index
    %c0_117 = arith.constant 0 : index
    %251 = vector.load %arg11[%c0_115, %c5_116, %c0_117] : memref<8x7x128xf32, #tpu.memory_space<vmem>>, vector<8x1x128xf32>
    tpu.vector_store %arg11[%c0_115, %c5_116, %c0_117], %250 {strides = array<i32>} : memref<8x7x128xf32, #tpu.memory_space<vmem>>, vector<8x1x128xf32>,
    %252 = vector.extract_strided_slice %233 {offsets = [48, 0], sizes = [8, 128], strides = [1, 1]} : vector<56x128xf32> to vector<8x128xf32>
    %253 = vector.shape_cast %252 : vector<8x128xf32> to vector<8x1x128xf32>
    %c0_118 = arith.constant 0 : index
    %c6_119 = arith.constant 6 : index
    %c0_120 = arith.constant 0 : index
    %254 = vector.load %arg11[%c0_118, %c6_119, %c0_120] : memref<8x7x128xf32, #tpu.memory_space<vmem>>, vector<8x1x128xf32>
    tpu.vector_store %arg11[%c0_118, %c6_119, %c0_120], %253 {strides = array<i32>} : memref<8x7x128xf32, #tpu.memory_space<vmem>>, vector<8x1x128xf32>,
    return
  }
  func.func @transform_0(%arg0: i32) -> (i32, i32, i32) {
    %c0_i32 = arith.constant 0 : i32
    %c0_i32_0 = arith.constant 0 : i32
    %c0_i32_1 = arith.constant 0 : i32
    return %c0_i32, %arg0, %c0_i32_0 : i32, i32, i32
  }
  func.func @transform_1(%arg0: i32) -> (i32, i32) {
    %c0_i32 = arith.constant 0 : i32
    %c0_i32_0 = arith.constant 0 : i32
    return %arg0, %c0_i32 : i32, i32
  }
  func.func @transform_2(%arg0: i32) -> (i32, i32) {
    %c0_i32 = arith.constant 0 : i32
    %c0_i32_0 = arith.constant 0 : i32
    %c0_i32_1 = arith.constant 0 : i32
    return %c0_i32, %c0_i32_0 : i32, i32
  }
  func.func @transform_3(%arg0: i32) -> (i32, i32) {
    %c0_i32 = arith.constant 0 : i32
    %c0_i32_0 = arith.constant 0 : i32
    %c0_i32_1 = arith.constant 0 : i32
    return %c0_i32, %c0_i32_0 : i32, i32
  }
  func.func @transform_4(%arg0: i32) -> (i32, i32) {
    %c0_i32 = arith.constant 0 : i32
    %c0_i32_0 = arith.constant 0 : i32
    %c0_i32_1 = arith.constant 0 : i32
    return %c0_i32, %c0_i32_0 : i32, i32
  }
  func.func @transform_5(%arg0: i32) -> (i32, i32) {
    %c0_i32 = arith.constant 0 : i32
    %c0_i32_0 = arith.constant 0 : i32
    %c0_i32_1 = arith.constant 0 : i32
    return %c0_i32, %c0_i32_0 : i32, i32
  }
  func.func @transform_6(%arg0: i32) -> (i32, i32) {
    %c0_i32 = arith.constant 0 : i32
    %c0_i32_0 = arith.constant 0 : i32
    %c0_i32_1 = arith.constant 0 : i32
    return %c0_i32, %c0_i32_0 : i32, i32
  }
  func.func @transform_7(%arg0: i32) -> (i32, i32) {
    %c0_i32 = arith.constant 0 : i32
    %c0_i32_0 = arith.constant 0 : i32
    %c0_i32_1 = arith.constant 0 : i32
    return %c0_i32, %c0_i32_0 : i32, i32
  }
  func.func @transform_8(%arg0: i32) -> (i32, i32) {
    %c0_i32 = arith.constant 0 : i32
    %c0_i32_0 = arith.constant 0 : i32
    return %arg0, %c0_i32 : i32, i32
  }
  func.func @transform_9(%arg0: i32) -> (i32, i32) {
    %c0_i32 = arith.constant 0 : i32
    %c0_i32_0 = arith.constant 0 : i32
    return %arg0, %c0_i32 : i32, i32
  }
  func.func @transform_10(%arg0: i32) -> (i32, i32, i32) {
    %c0_i32 = arith.constant 0 : i32
    %c0_i32_0 = arith.constant 0 : i32
    %c0_i32_1 = arith.constant 0 : i32
    return %arg0, %c0_i32, %c0_i32_0 : i32, i32, i32
  }
  func.func @transform_11(%arg0: i32) -> (i32, i32) {
    %c0_i32 = arith.constant 0 : i32
    %c0_i32_0 = arith.constant 0 : i32
    return %arg0, %c0_i32 : i32, i32
  }
  func.func @transform_12(%arg0: i32) -> (i32, i32) {
    %c0_i32 = arith.constant 0 : i32
    %c0_i32_0 = arith.constant 0 : i32
    return %arg0, %c0_i32 : i32, i32
  }
}

</mosaic_0001>

<bundles_post_ra>
// kernel: decoder_forward.1
= control target key start
LH: loop header
LB: loop body
LE: loop exit
PB: predicated region body
PF: predicated region fallthrough
CT: control target
= control target key end

     0   :  { %18 = vsyncpa [#allocation5], 0  ;;  %s6713_s0 = inlined_call_operand.vmem [shape: bf16[7,8,32], index: 0, kind: input, shape index: {}]   ;;  %s6714_s1 = inlined_call_operand.vmem [shape: bf16[8,4096], index: 1, kind: input, shape index: {}]   ;;  %s6715_s2 = inlined_call_operand.vmem [shape: bf16[32,128], index: 2, kind: input, shape index: {}]   ;;  %s6716_s3 = inlined_call_operand.hbm [shape: bf16[4096,128], index: 3, kind: input, shape index: {}]   ;;  %s6717_s4 = inlined_call_operand.vmem [shape: f32[32,128], index: 4, kind: input, shape index: {}]   ;;  %s6718_s5 = inlined_call_operand.vmem [shape: f32[1,128], index: 5, kind: input, shape index: {}]   ;;  %s6719_s6 = inlined_call_operand.vmem [shape: bf16[32,128], index: 6, kind: input, shape index: {}]   ;;  %s6720_s7 = inlined_call_operand.vmem [shape: f32[1,128], index: 7, kind: input, shape index: {}]   ;;  %s6721_s8 = inlined_call_operand.vmem [shape: f32[8,32], index: 8, kind: input, shape index: {}]   ;;  %s6722_s9 = inlined_call_operand.vmem [shape: f32[8,32], index: 9, kind: input, shape index: {}]   ;;  %s6723_s10 = inlined_call_operand.vmem [shape: f32[8,7,128], index: 10, kind: output, shape index: {0}]   ;;  %s6724_s11 = inlined_call_operand.hbm [shape: f32[8,32], index: 11, kind: output, shape index: {1}]   ;;  %s6725_s12 = inlined_call_operand.hbm [shape: f32[8,32], index: 12, kind: output, shape index: {2}]  }
   0x1   :  { %19 = vsyncpa [#allocation6], 0 }
   0x2   :  { %20 = vsyncpa [#allocation9], 0  ;;  %s6046_s21 = smov [#allocation4]  }
   0x3   :  { %s32_s22 = sshll.u32 %s6046_s21, 4  ;;  %s33_s22 = int_to_ptr.vmem [resolvable:$true] %s32_s22 }
   0x4   :  { %s5988_s23 = scalar_lea.vmem %s33_s22, 32768  ;;  %p5993_p1 = scmp.lt.s32.totalorder %s33_s22, %s33_s22 }
   0x5   :  { %p5989_p0 = scmp.ne.s32.totalorder %s33_s22, %s5988_s23  ;;  %p5994_p2 = scmp.lt.s32.totalorder %s5988_s23, %s5988_s23 }
   0x7   :  { %p5995_p3 = por %p5994_p2, %p5993_p1 }
   0x9   :  { %p5996_p4 = pnand %p5995_p3, %p5989_p0 }
   0xb   :  { %5999 = shalt.err (!%p5996_p4)
}
   0xc   :  { %s6047_s24 = smov 64   ;;  %s6048_s25 = smov 4  }
   0xd   :  { %38 = dma.hbm_to_vmem [thread:$0]  %s6716_s3, 32768, %s33_s22, [#allocation5], %s6047_s24, %s6047_s24, %s6048_s25  }
   0xe   :  { %6040 = dma.done.wait [#allocation5], 32768  }
   0xf   :  { %6041 = vsyncadd [#allocation5], 4294934528  ;;  %v6049_v0 = vmov 0.0   ;;  %vm6050_vm0 = vmmov 0   ;;  %v5620_v1 = vld [vmem:[%s6715_s2 + $0x8] sm:$0xff]   ;;  %v5621_v2 = vld [vmem:[%s6715_s2] sm:$0xff]  }
  0x10   :  { %5465 = vmatprep.subr.bf16.mxu1 %v6049_v0  ;;  %5481 = vmatprep.subr.bf16.mxu0 %v6049_v0  ;;  %v5622_v3 = vld [vmem:[%s6715_s2 + $0x8] sm:$0xff]   ;;  %v5624_v4 = vld [vmem:[%s6715_s2] sm:$0xff]   ;;  %vm72_vm1 = vcmask 261120   ;;  %v4701_v13 = vld [vmem:[%s6713_s0 + $0x10] sm:$0xf]  ;;  %s6051_s15 = smov 32  }
  0x11   :  { %5469 = vmatprep.mubr.msk.bf16.mxu1 %vm6050_vm0, %v6049_v0  ;;  %5485 = vmatprep.mubr.msk.bf16.mxu0 %vm6050_vm0, %v6049_v0  ;;  %v55_v5 = vld [vmem:[%s6713_s0] sm:$0xf]  ;;  %v5623_v6 = vld [vmem:[%s6715_s2 + $0x8] sm:$0xff]   ;;  %v4689_v11 = vld [vmem:[%s6713_s0 + $0x4] sm:$0xf]  ;;  %s6053_s30 = smov 96  }
  0x12   :  { %5466 = vmatpush3.bf16.msra.mxu1 %v5620_v1  ;;  %5482 = vmatpush3.bf16.msra.mxu0 %v5622_v3  ;;  %v4693_v7 = vld [vmem:[%s6713_s0 + $0x8] sm:$0xf]  ;;  %v5625_v9 = vld [vmem:[%s6715_s2] sm:$0xff]   ;;  %v4697_v16 = vld [vmem:[%s6713_s0 + $0xc] sm:$0xf]  ;;  %s6054_s3 = smov [#allocation7]  }
  0x13   :  { %5467 = vmatprep.subr.bf16.mxu1 %v6049_v0  ;;  %5483 = vmatprep.subr.bf16.mxu0 %v6049_v0  ;;  %v5626_v8 = vld [vmem:[%s6715_s2 + $0x8] sm:$0xff]   ;;  %v5628_v10 = vld [vmem:[%s6715_s2] sm:$0xff]   ;;  %v5633_v18 = vld [vmem:[#allocation4 + $0xf8] sm:$0xff]   ;;  %s6055_s13 = smov [#allocation8]  }
  0x14   :  { %v5627_v12 = vld [vmem:[%s6715_s2 + $0x8] sm:$0xff]   ;;  %v5629_v15 = vld [vmem:[%s6715_s2] sm:$0xff]   ;;  %v4709_v20 = vld [vmem:[%s6713_s0 + $0x18] sm:$0xf]  ;;  %s4671_s14 = sshll.u32 %s6055_s13, 4  ;;  %s4672_s14 = int_to_ptr.vmem [resolvable:$true] %s4671_s14 }
  0x15   :  { %v5630_v14 = vld [vmem:[%s6715_s2 + $0x8] sm:$0xff]   ;;  %v5632_v17 = vld [vmem:[%s6715_s2] sm:$0xff]   ;;  %v5635_v21 = vld [vmem:[#allocation4 + $0xb8] sm:$0xff]  }
  0x16   :  { %5468 = vmatpush3.bf16.msra.mxu1 %v5621_v2  ;;  %5484 = vmatpush3.bf16.msra.mxu0 %v5624_v4  ;;  %v5631_v19 = vld [vmem:[%s6715_s2 + $0x8] sm:$0xff]   ;;  %v5634_v23 = vld [vmem:[%s6715_s2] sm:$0xff]   ;;  %v5636_v24 = vld [vmem:[#allocation4 + $0x78] sm:$0xff]  }
  0x17   :  { %5473 = vmatprep.subr.bf16.mxu1 %v6049_v0  ;;  %5497 = vmatprep.subr.bf16.mxu0 %v6049_v0  ;;  %v5637_v22 = vld [vmem:[#allocation4 + $0xf0] sm:$0xff]   ;;  %v4705_v25 = vld [vmem:[%s6713_s0 + $0x14] sm:$0xf]  ;;  %v5641_v27 = vld [vmem:[#allocation4 + $0xe8] sm:$0xff]  }
  0x18   :  { %v5639_v26 = vld [vmem:[#allocation4 + $0xb0] sm:$0xff]   ;;  %v5638_v28 = vld [vmem:[#allocation4 + $0x38] sm:$0xff]   ;;  %v5643_v30 = vld [vmem:[#allocation4 + $0xa8] sm:$0xff]  }
  0x19   :  { %5470 = vmatmul.mubr.msk.bf16.vlgmr.msra.gmra.mxu1 %vm72_vm1, %v55_v5  ;;  %5486 = vmatmul.mubr.msk.bf16.vlgmr.msra.gmra.mxu0 %vm72_vm1, %v4693_v7  ;;  %v5640_v29 = vld [vmem:[#allocation4 + $0x70] sm:$0xff]   ;;  %v5645_v31 = vld [vmem:[#allocation4 + $0xe0] sm:$0xff]   ;;  %v5644_v33 = vld [vmem:[#allocation4 + $0x68] sm:$0xff]  }
  0x1a   :  { %5474 = vmatpush3.bf16.msra.mxu1 %v5623_v6  ;;  %5477 = vmatprep.mubr.msk.bf16.mxu1 %vm6050_vm0, %v6049_v0  ;;  %v5642_v32 = vld [vmem:[#allocation4 + $0x30] sm:$0xff]   ;;  %v5647_v34 = vld [vmem:[#allocation4 + $0xa0] sm:$0xff]   ;;  %v5649_v35 = vld [vmem:[#allocation4 + $0xd8] sm:$0xff]  }
  0x1b   :  { %5475 = vmatprep.subr.bf16.mxu1 %v6049_v0  ;;  %5498 = vmatpush3.bf16.msra.mxu0 %v5626_v8  ;;  %v5646_v36 = vld [vmem:[#allocation4 + $0x28] sm:$0xff]   ;;  %v5648_v37 = vld [vmem:[#allocation4 + $0x60] sm:$0xff]   ;;  %v5651_v38 = vld [vmem:[#allocation4 + $0x98] sm:$0xff]  }
  0x1c   :  { %5501 = vmatprep.mubr.msk.bf16.mxu0 %vm6050_vm0, %v6049_v0  ;;  %5499 = vmatprep.subr.bf16.mxu0 %v6049_v0  ;;  %v5653_v39 = vld [vmem:[#allocation4 + $0xd0] sm:$0xff]   ;;  %v5650_v40 = vld [vmem:[#allocation4 + $0x20] sm:$0xff]   ;;  %v5652_v41 = vld [vmem:[#allocation4 + $0x58] sm:$0xff]  }
  0x1d   :  { %v5655_v42 = vld [vmem:[#allocation4 + $0x90] sm:$0xff]   ;;  %v5657_v43 = vld [vmem:[#allocation4 + $0xc8] sm:$0xff]   ;;  %v5654_v44 = vld [vmem:[#allocation4 + $0x18] sm:$0xff]  }
  0x1e   :  { %5476 = vmatpush3.bf16.msra.mxu1 %v5625_v9  ;;  %v5656_v45 = vld [vmem:[#allocation4 + $0x50] sm:$0xff]   ;;  %v5659_v47 = vld [vmem:[#allocation4 + $0x88] sm:$0xff]   ;;  %v5661_v49 = vld [vmem:[#allocation4 + $0xc0] sm:$0xff]  }
  0x1f   :  { %5489 = vmatprep.subr.bf16.mxu1 %v6049_v0  ;;  %5500 = vmatpush3.bf16.msra.mxu0 %v5628_v10  ;;  %v490_v46 = vld [vmem:[%s6714_s1 + $0x8] sm:$0xff]  ;;  %v489_v51 = vld [vmem:[%s6714_s1] sm:$0xff]  ;;  %v5663_v54 = vld [vmem:[#allocation4 + $0x80] sm:$0xff]  }
  0x20   :  { %5513 = vmatprep.subr.bf16.mxu0 %v6049_v0  ;;  %v4717_v48 = vcombine.high %v490_v46, %v490_v46  ;;  %v5658_v50 = vld [vmem:[#allocation4 + $0x10] sm:$0xff]   ;;  %v5660_v52 = vld [vmem:[#allocation4 + $0x48] sm:$0xff]   ;;  %v4715_v53 = vcombine.high %v489_v51, %v489_v51  ;;  %v5667_v55 = vld [vmem:[#allocation4 + $0x1f8] sm:$0xff]   ;;  %v4716_v58 = vcombine.low %v490_v46, %v490_v46  ;;  %v4714_v1 = vcombine.low %v489_v51, %v489_v51 }
  0x21   :  { %5478 = vmatmul.mubr.msk.bf16.vlgmr.msra.gmra.mxu1 %vm72_vm1, %v4689_v11  ;;  %v5662_v56 = vld [vmem:[#allocation4 + $0x8] sm:$0xff]   ;;  %v5664_v57 = vld [vmem:[#allocation4 + $0x40] sm:$0xff]   ;;  %v5669_v59 = vld [vmem:[#allocation4 + $0x1b8] sm:$0xff]  }
  0x22   :  { %5490 = vmatpush3.bf16.msra.mxu1 %v5627_v12  ;;  %5493 = vmatprep.mubr.msk.bf16.mxu1 %vm6050_vm0, %v6049_v0  ;;  %v5673_v60 = vld [vmem:[#allocation4 + $0x1f0] sm:$0xff]   ;;  %v5668_v61 = vld [vmem:[#allocation4] sm:$0xff]   ;;  %v5672_v62 = vld [vmem:[#allocation4 + $0x178] sm:$0xff]  }
  0x23   :  { %5491 = vmatprep.subr.bf16.mxu1 %v6049_v0  ;;  %5502 = vmatmul.mubr.msk.bf16.vlgmr.msra.gmra.mxu0 %vm72_vm1, %v4701_v13  ;;  %v5675_v63 = vld [vmem:[#allocation4 + $0x1b0] sm:$0xff]   ;;  %v5677_v2 = vld [vmem:[#allocation4 + $0x1e8] sm:$0xff]   ;;  %v5674_v3 = vld [vmem:[#allocation4 + $0x138] sm:$0xff]  }
  0x24   :  { %5514 = vmatpush3.bf16.msra.mxu0 %v5630_v14  ;;  %5517 = vmatprep.mubr.msk.bf16.mxu0 %vm6050_vm0, %v6049_v0  ;;  %v5676_v4 = vld [vmem:[#allocation4 + $0x170] sm:$0xff]   ;;  %v5679_v5 = vld [vmem:[#allocation4 + $0x1a8] sm:$0xff]   ;;  %v5681_v6 = vld [vmem:[#allocation4 + $0x1e0] sm:$0xff]  }
  0x25   :  { %5515 = vmatprep.subr.bf16.mxu0 %v6049_v0  ;;  %v5678_v7 = vld [vmem:[#allocation4 + $0x130] sm:$0xff]   ;;  %v5680_v8 = vld [vmem:[#allocation4 + $0x168] sm:$0xff]   ;;  %v5683_v9 = vld [vmem:[#allocation4 + $0x1a0] sm:$0xff]  }
  0x26   :  { %5492 = vmatpush3.bf16.msra.mxu1 %v5629_v15  ;;  %v5685_v10 = vld [vmem:[#allocation4 + $0x1d8] sm:$0xff]   ;;  %v5682_v11 = vld [vmem:[#allocation4 + $0x128] sm:$0xff]   ;;  %v5684_v12 = vld [vmem:[#allocation4 + $0x160] sm:$0xff]  }
  0x27   :  { %5505 = vmatprep.subr.bf16.mxu1 %v6049_v0  ;;  %v5687_v13 = vld [vmem:[#allocation4 + $0x198] sm:$0xff]   ;;  %v5689_v14 = vld [vmem:[#allocation4 + $0x1d0] sm:$0xff]   ;;  %v5686_v15 = vld [vmem:[#allocation4 + $0x120] sm:$0xff]  }
  0x28   :  { %5516 = vmatpush3.bf16.msra.mxu0 %v5632_v17  ;;  %v5690_v17 = vld [vmem:[#allocation4 + $0x118] sm:$0xff]   ;;  %v5716_v46 = vld [vmem:[#allocation4 + $0x268] sm:$0xff]  }
  0x29   :  { %5494 = vmatmul.mubr.msk.bf16.vlgmr.msra.gmra.mxu1 %vm72_vm1, %v4697_v16  ;;  %5094 = vmatprep.subr.bf16.mxu0 %v5633_v18  ;;  %v5688_v16 = vld [vmem:[#allocation4 + $0x158] sm:$0xff]   ;;  %v5691_v18 = vld [vmem:[#allocation4 + $0x190] sm:$0xff]  }
  0x2a   :  { %5506 = vmatpush3.bf16.msra.mxu1 %v5631_v19  ;;  %5509 = vmatprep.mubr.msk.bf16.mxu1 %vm6050_vm0, %v6049_v0  ;;  %v5693_v19 = vld [vmem:[#allocation4 + $0x1c8] sm:$0xff]   ;;  %v5723_v51 = vld [vmem:[#allocation4 + $0x298] sm:$0xff]  }
  0x2b   :  { %5507 = vmatprep.subr.bf16.mxu1 %v6049_v0  ;;  %5518 = vmatmul.mubr.msk.bf16.vlgmr.msra.gmra.mxu0 %vm72_vm1, %v4709_v20  ;;  %v5692_v20 = vld [vmem:[#allocation4 + $0x150] sm:$0xff]  }
  0x2c   :  { %5095 = vmatpush3.bf16.msra.mxu0 %v5635_v21  ;;  %2744 = vmatprep.mubr.bf16.mxu0 %v4717_v48  ;;  %v5695_v21 = vld [vmem:[#allocation4 + $0x188] sm:$0xff]   ;;  %v5721_v48 = vld [vmem:[#allocation4 + $0x2d8] sm:$0xff]  }
  0x2d   :  { %5096 = vmatprep.subr.bf16.mxu0 %v5637_v22  ;;  %v492_v22 = vld [vmem:[%s6714_s1 + $0x18] sm:$0xff] }
  0x2e   :  { %5508 = vmatpush3.bf16.msra.mxu1 %v5634_v23  ;;  %v5697_v23 = vld [vmem:[#allocation4 + $0x1c0] sm:$0xff]  }
  0x2f   :  { %5072 = vmatprep.subr.bf16.mxu1 %v5636_v24  ;;  %v4721_v24 = vcombine.high %v492_v22, %v492_v22 }
  0x30   :  { %5097 = vmatpush3.bf16.msra.mxu0 %v5639_v26  ;;  %v5696_v26 = vld [vmem:[#allocation4 + $0x148] sm:$0xff]  }
  0x31   :  { %5510 = vmatmul.mubr.msk.bf16.vlgmr.msra.gmra.mxu1 %vm72_vm1, %v4705_v25  ;;  %5098 = vmatprep.subr.bf16.mxu0 %v5641_v27  ;;  %v5694_v25 = vld [vmem:[#allocation4 + $0x110] sm:$0xff]   ;;  %v491_v27 = vld [vmem:[%s6714_s1 + $0x10] sm:$0xff] }
  0x32   :  { %5073 = vmatpush3.bf16.msra.mxu1 %v5638_v28  ;;  %2704 = vmatprep.mubr.bf16.mxu1 %v4715_v53  ;;  %v5699_v28 = vld [vmem:[#allocation4 + $0x180] sm:$0xff]  }
  0x33   :  { %5074 = vmatprep.subr.bf16.mxu1 %v5640_v29  ;;  %v4719_v29 = vcombine.high %v491_v27, %v491_v27  ;;  %v5722_v53 = vld [vmem:[#allocation4 + $0x220] sm:$0xff]  }
  0x34   :  { %5099 = vmatpush3.bf16.msra.mxu0 %v5643_v30  ;;  %v5703_v30 = vld [vmem:[#allocation4 + $0x2f8] sm:$0xff]  }
  0x35   :  { %5100 = vmatprep.subr.bf16.mxu0 %v5645_v31  ;;  %v5698_v31 = vld [vmem:[#allocation4 + $0x108] sm:$0xff]  }
  0x36   :  { %5075 = vmatpush3.bf16.msra.mxu1 %v5642_v32  ;;  %v5700_v32 = vld [vmem:[#allocation4 + $0x140] sm:$0xff]  }
  0x37   :  { %5076 = vmatprep.subr.bf16.mxu1 %v5644_v33  ;;  %v4720_v33 = vcombine.low %v492_v22, %v492_v22  ;;  %v5755_v22 = vld [vmem:[#allocation4 + $0x3a0] sm:$0xff]  }
  0x38   :  { %5101 = vmatpush3.bf16.msra.mxu0 %v5647_v34  ;;  %v5705_v34 = vld [vmem:[#allocation4 + $0x2b8] sm:$0xff]  }
  0x39   :  { %5102 = vmatprep.subr.bf16.mxu0 %v5649_v35  ;;  %v5709_v35 = vld [vmem:[#allocation4 + $0x2f0] sm:$0xff]  }
  0x3a   :  { %5077 = vmatpush3.bf16.msra.mxu1 %v5646_v36  ;;  %v5704_v36 = vld [vmem:[#allocation4 + $0x100] sm:$0xff]  }
  0x3b   :  { %5078 = vmatprep.subr.bf16.mxu1 %v5648_v37  ;;  %v5708_v37 = vld [vmem:[#allocation4 + $0x278] sm:$0xff]  }
  0x3c   :  { %5103 = vmatpush3.bf16.msra.mxu0 %v5651_v38  ;;  %v5711_v38 = vld [vmem:[#allocation4 + $0x2b0] sm:$0xff]  }
  0x3d   :  { %5104 = vmatprep.subr.bf16.mxu0 %v5653_v39  ;;  %v4718_v39 = vcombine.low %v491_v27, %v491_v27  ;;  %v5761_v27 = vld [vmem:[#allocation4 + $0x3d0] sm:$0xff]  }
  0x3e   :  { %5079 = vmatpush3.bf16.msra.mxu1 %v5650_v40  ;;  %v5713_v40 = vld [vmem:[#allocation4 + $0x2e8] sm:$0xff]  }
  0x3f   :  { %5080 = vmatprep.subr.bf16.mxu1 %v5652_v41  ;;  %v5710_v41 = vld [vmem:[#allocation4 + $0x238] sm:$0xff]  }
  0x40   :  { %5105 = vmatpush3.bf16.msra.mxu0 %v5655_v42  ;;  %v5712_v42 = vld [vmem:[#allocation4 + $0x270] sm:$0xff]  }
  0x41   :  { %5106 = vmatprep.subr.bf16.mxu0 %v5657_v43  ;;  %v5715_v43 = vld [vmem:[#allocation4 + $0x2a8] sm:$0xff]  }
  0x42   :  { %5081 = vmatpush3.bf16.msra.mxu1 %v5654_v44  ;;  %v5717_v44 = vld [vmem:[#allocation4 + $0x2e0] sm:$0xff]  }
  0x43   :  { %5082 = vmatprep.subr.bf16.mxu1 %v5656_v45  ;;  %v5714_v45 = vld [vmem:[#allocation4 + $0x230] sm:$0xff]  }
  0x44   :  { %5107 = vmatpush3.bf16.msra.mxu0 %v5659_v47  ;;  %v5719_v47 = vld [vmem:[#allocation4 + $0x2a0] sm:$0xff]  }
  0x45   :  { %5108 = vmatprep.subr.bf16.mxu0 %v5661_v49  ;;  %v5718_v49 = vld [vmem:[#allocation4 + $0x228] sm:$0xff]  }
  0x46   :  { %5083 = vmatpush3.bf16.msra.mxu1 %v5658_v50  ;;  %v5720_v50 = vld [vmem:[#allocation4 + $0x260] sm:$0xff]  }
  0x47   :  { %5084 = vmatprep.subr.bf16.mxu1 %v5660_v52  ;;  %v5725_v52 = vld [vmem:[#allocation4 + $0x2d0] sm:$0xff]  }
  0x48   :  { %5109 = vmatpush3.bf16.msra.mxu0 %v5663_v54  ;;  %v5724_v54 = vld [vmem:[#allocation4 + $0x258] sm:$0xff]  }
  0x49   :  { %5138 = vmatprep.subr.bf16.mxu0 %v5667_v55  ;;  %v5727_v55 = vld [vmem:[#allocation4 + $0x290] sm:$0xff]  }
  0x4a   :  { %5085 = vmatpush3.bf16.msra.mxu1 %v5662_v56  ;;  %v5729_v56 = vld [vmem:[#allocation4 + $0x2c8] sm:$0xff]  }
  0x4b   :  { %5086 = vmatprep.subr.bf16.mxu1 %v5664_v57  ;;  %2745 = vmatmul.mubr.bf16.vlgmr.msra.gmra.mxu0 %v4716_v58  ;;  %v5726_v57 = vld [vmem:[#allocation4 + $0x218] sm:$0xff]   ;;  %v5728_v58 = vld [vmem:[#allocation4 + $0x250] sm:$0xff]  }
  0x4c   :  { %5139 = vmatpush3.bf16.msra.mxu0 %v5669_v59  ;;  %2824 = vmatprep.mubr.bf16.mxu0 %v4721_v24  ;;  %v5730_v59 = vld [vmem:[#allocation4 + $0x210] sm:$0xff]   ;;  %v5754_v24 = vld [vmem:[#allocation4 + $0x328] sm:$0xff]  }
  0x4d   :  { %5140 = vmatprep.subr.bf16.mxu0 %v5673_v60  ;;  %v5731_v60 = vld [vmem:[#allocation4 + $0x288] sm:$0xff]  }
  0x4e   :  { %5087 = vmatpush3.bf16.msra.mxu1 %v5668_v61  ;;  %v494_v61 = vld [vmem:[%s6714_s1 + $0x28] sm:$0xff] }
  0x4f   :  { %5116 = vmatprep.subr.bf16.mxu1 %v5672_v62  ;;  %v5733_v62 = vld [vmem:[#allocation4 + $0x2c0] sm:$0xff]  }
  0x50   :  { %5141 = vmatpush3.bf16.msra.mxu0 %v5675_v63  ;;  %v4725_v63 = vcombine.high %v494_v61, %v494_v61 }
  0x51   :  { %2705 = vmatmul.mubr.bf16.vlgmr.msra.gmra.mxu1 %v4714_v1  ;;  %5142 = vmatprep.subr.bf16.mxu0 %v5677_v2  ;;  %v5732_v1 = vld [vmem:[#allocation4 + $0x248] sm:$0xff]   ;;  %v5735_v2 = vld [vmem:[#allocation4 + $0x280] sm:$0xff]  }
  0x52   :  { %5117 = vmatpush3.bf16.msra.mxu1 %v5674_v3  ;;  %2784 = vmatprep.mubr.bf16.mxu1 %v4719_v29  ;;  %v493_v3 = vld [vmem:[%s6714_s1 + $0x20] sm:$0xff]  ;;  %v5760_v29 = vld [vmem:[#allocation4 + $0x358] sm:$0xff]  }
  0x53   :  { %5118 = vmatprep.subr.bf16.mxu1 %v5676_v4  ;;  %v5739_v4 = vld [vmem:[#allocation4 + $0x3f8] sm:$0xff]  }
  0x54   :  { %5143 = vmatpush3.bf16.msra.mxu0 %v5679_v5  ;;  %v4723_v5 = vcombine.high %v493_v3, %v493_v3 }
  0x55   :  { %5144 = vmatprep.subr.bf16.mxu0 %v5681_v6  ;;  %v5734_v6 = vld [vmem:[#allocation4 + $0x208] sm:$0xff]  }
  0x56   :  { %5119 = vmatpush3.bf16.msra.mxu1 %v5678_v7  ;;  %v5736_v7 = vld [vmem:[#allocation4 + $0x240] sm:$0xff]  }
  0x57   :  { %5120 = vmatprep.subr.bf16.mxu1 %v5680_v8  ;;  %v4724_v8 = vcombine.low %v494_v61, %v494_v61  ;;  %v5793_v61 = vld [vmem:[#allocation4 + $0x4d8] sm:$0xff]  }
  0x58   :  { %5145 = vmatpush3.bf16.msra.mxu0 %v5683_v9  ;;  %v5741_v9 = vld [vmem:[#allocation4 + $0x3b8] sm:$0xff]  }
  0x59   :  { %5146 = vmatprep.subr.bf16.mxu0 %v5685_v10  ;;  %v5745_v10 = vld [vmem:[#allocation4 + $0x3f0] sm:$0xff]  }
  0x5a   :  { %5121 = vmatpush3.bf16.msra.mxu1 %v5682_v11  ;;  %v5740_v11 = vld [vmem:[#allocation4 + $0x200] sm:$0xff]  }
  0x5b   :  { %5122 = vmatprep.subr.bf16.mxu1 %v5684_v12  ;;  %v5744_v12 = vld [vmem:[#allocation4 + $0x378] sm:$0xff]  }
  0x5c   :  { %5147 = vmatpush3.bf16.msra.mxu0 %v5687_v13  ;;  %v5747_v13 = vld [vmem:[#allocation4 + $0x3b0] sm:$0xff]  }
  0x5d   :  { %5148 = vmatprep.subr.bf16.mxu0 %v5689_v14  ;;  %v4722_v14 = vcombine.low %v493_v3, %v493_v3  ;;  %v5794_v3 = vld [vmem:[#allocation4 + $0x420] sm:$0xff]  }
  0x5e   :  { %5123 = vmatpush3.bf16.msra.mxu1 %v5686_v15  ;;  %v5749_v15 = vld [vmem:[#allocation4 + $0x3e8] sm:$0xff]  }
  0x5f   :  { %5124 = vmatprep.subr.bf16.mxu1 %v5688_v16  ;;  %v5746_v16 = vld [vmem:[#allocation4 + $0x338] sm:$0xff]  }
  0x60   :  { %5149 = vmatpush3.bf16.msra.mxu0 %v5691_v18  ;;  %v5751_v18 = vld [vmem:[#allocation4 + $0x3a8] sm:$0xff]  }
  0x61   :  { %5150 = vmatprep.subr.bf16.mxu0 %v5693_v19  ;;  %v5753_v19 = vld [vmem:[#allocation4 + $0x3e0] sm:$0xff]  }
  0x62   :  { %5125 = vmatpush3.bf16.msra.mxu1 %v5690_v17  ;;  %v5748_v17 = vld [vmem:[#allocation4 + $0x370] sm:$0xff]  }
  0x63   :  { %5126 = vmatprep.subr.bf16.mxu1 %v5692_v20  ;;  %v5750_v20 = vld [vmem:[#allocation4 + $0x330] sm:$0xff]  }
  0x64   :  { %5151 = vmatpush3.bf16.msra.mxu0 %v5695_v21  ;;  %v5752_v21 = vld [vmem:[#allocation4 + $0x368] sm:$0xff]  }
  0x65   :  { %5152 = vmatprep.subr.bf16.mxu0 %v5697_v23  ;;  %v5757_v23 = vld [vmem:[#allocation4 + $0x3d8] sm:$0xff]  }
  0x66   :  { %5127 = vmatpush3.bf16.msra.mxu1 %v5694_v25  ;;  %v5756_v25 = vld [vmem:[#allocation4 + $0x360] sm:$0xff]  }
  0x67   :  { %5128 = vmatprep.subr.bf16.mxu1 %v5696_v26  ;;  %v5759_v26 = vld [vmem:[#allocation4 + $0x398] sm:$0xff]  }
  0x68   :  { %5153 = vmatpush3.bf16.msra.mxu0 %v5699_v28  ;;  %v5758_v28 = vld [vmem:[#allocation4 + $0x320] sm:$0xff]  }
  0x69   :  { %5182 = vmatprep.subr.bf16.mxu0 %v5703_v30  ;;  %v5763_v30 = vld [vmem:[#allocation4 + $0x390] sm:$0xff]  }
  0x6a   :  { %5129 = vmatpush3.bf16.msra.mxu1 %v5698_v31  ;;  %v5765_v31 = vld [vmem:[#allocation4 + $0x3c8] sm:$0xff]  }
  0x6b   :  { %5130 = vmatprep.subr.bf16.mxu1 %v5700_v32  ;;  %2825 = vmatmul.mubr.bf16.vlgmr.msra.gmra.mxu0 %v4720_v33  ;;  %v5762_v32 = vld [vmem:[#allocation4 + $0x318] sm:$0xff]   ;;  %v5764_v33 = vld [vmem:[#allocation4 + $0x350] sm:$0xff]  }
  0x6c   :  { %5183 = vmatpush3.bf16.msra.mxu0 %v5705_v34  ;;  %2904 = vmatprep.mubr.bf16.mxu0 %v4725_v63  ;;  %v5767_v34 = vld [vmem:[#allocation4 + $0x388] sm:$0xff]   ;;  %v5792_v63 = vld [vmem:[#allocation4 + $0x460] sm:$0xff]  }
  0x6d   :  { %5184 = vmatprep.subr.bf16.mxu0 %v5709_v35  ;;  %v5769_v35 = vld [vmem:[#allocation4 + $0x3c0] sm:$0xff]  }
  0x6e   :  { %5131 = vmatpush3.bf16.msra.mxu1 %v5704_v36  ;;  %v496_v36 = vld [vmem:[%s6714_s1 + $0x38] sm:$0xff] }
  0x6f   :  { %5160 = vmatprep.subr.bf16.mxu1 %v5708_v37  ;;  %v5766_v37 = vld [vmem:[#allocation4 + $0x310] sm:$0xff]  }
  0x70   :  { %5185 = vmatpush3.bf16.msra.mxu0 %v5711_v38  ;;  %v4729_v38 = vcombine.high %v496_v36, %v496_v36 }
  0x71   :  { %2785 = vmatmul.mubr.bf16.vlgmr.msra.gmra.mxu1 %v4718_v39  ;;  %5186 = vmatprep.subr.bf16.mxu0 %v5713_v40  ;;  %v5768_v39 = vld [vmem:[#allocation4 + $0x348] sm:$0xff]   ;;  %v5771_v40 = vld [vmem:[#allocation4 + $0x380] sm:$0xff]  }
  0x72   :  { %5161 = vmatpush3.bf16.msra.mxu1 %v5710_v41  ;;  %2864 = vmatprep.mubr.bf16.mxu1 %v4723_v5  ;;  %v495_v41 = vld [vmem:[%s6714_s1 + $0x30] sm:$0xff]  ;;  %v5799_v5 = vld [vmem:[#allocation4 + $0x490] sm:$0xff]  }
  0x73   :  { %5162 = vmatprep.subr.bf16.mxu1 %v5712_v42  ;;  %v5775_v42 = vld [vmem:[#allocation4 + $0x4f8] sm:$0xff]  }
  0x74   :  { %5187 = vmatpush3.bf16.msra.mxu0 %v5715_v43  ;;  %v4727_v43 = vcombine.high %v495_v41, %v495_v41 }
  0x75   :  { %5188 = vmatprep.subr.bf16.mxu0 %v5717_v44  ;;  %v5770_v44 = vld [vmem:[#allocation4 + $0x308] sm:$0xff]  }
  0x76   :  { %5163 = vmatpush3.bf16.msra.mxu1 %v5714_v45  ;;  %v5772_v45 = vld [vmem:[#allocation4 + $0x340] sm:$0xff]  }
  0x77   :  { %5164 = vmatprep.subr.bf16.mxu1 %v5716_v46  ;;  %v4728_v46 = vcombine.low %v496_v36, %v496_v36  ;;  %v5829_v36 = vld [vmem:[#allocation4 + $0x5d8] sm:$0xff]  }
  0x78   :  { %5189 = vmatpush3.bf16.msra.mxu0 %v5719_v47  ;;  %v5777_v47 = vld [vmem:[#allocation4 + $0x4b8] sm:$0xff]  }
  0x79   :  { %5190 = vmatprep.subr.bf16.mxu0 %v5721_v48  ;;  %v5781_v48 = vld [vmem:[#allocation4 + $0x4f0] sm:$0xff]  }
  0x7a   :  { %5165 = vmatpush3.bf16.msra.mxu1 %v5718_v49  ;;  %v5776_v49 = vld [vmem:[#allocation4 + $0x300] sm:$0xff]  }
  0x7b   :  { %5166 = vmatprep.subr.bf16.mxu1 %v5720_v50  ;;  %v5780_v50 = vld [vmem:[#allocation4 + $0x478] sm:$0xff]  }
  0x7c   :  { %5191 = vmatpush3.bf16.msra.mxu0 %v5723_v51  ;;  %v5783_v51 = vld [vmem:[#allocation4 + $0x4b0] sm:$0xff]  }
  0x7d   :  { %5192 = vmatprep.subr.bf16.mxu0 %v5725_v52  ;;  %v4726_v52 = vcombine.low %v495_v41, %v495_v41  ;;  %v5833_v41 = vld [vmem:[#allocation4 + $0x5d0] sm:$0xff]  }
  0x7e   :  { %5167 = vmatpush3.bf16.msra.mxu1 %v5722_v53  ;;  %v5785_v53 = vld [vmem:[#allocation4 + $0x4e8] sm:$0xff]  }
  0x7f   :  { %5168 = vmatprep.subr.bf16.mxu1 %v5724_v54  ;;  %v5782_v54 = vld [vmem:[#allocation4 + $0x438] sm:$0xff]  }
  0x80   :  { %5193 = vmatpush3.bf16.msra.mxu0 %v5727_v55  ;;  %v5784_v55 = vld [vmem:[#allocation4 + $0x470] sm:$0xff]  }
  0x81   :  { %5194 = vmatprep.subr.bf16.mxu0 %v5729_v56  ;;  %v5787_v56 = vld [vmem:[#allocation4 + $0x4a8] sm:$0xff]  }
  0x82   :  { %5169 = vmatpush3.bf16.msra.mxu1 %v5726_v57  ;;  %v5789_v57 = vld [vmem:[#allocation4 + $0x4e0] sm:$0xff]  }
  0x83   :  { %5170 = vmatprep.subr.bf16.mxu1 %v5728_v58  ;;  %v5786_v58 = vld [vmem:[#allocation4 + $0x430] sm:$0xff]  }
  0x84   :  { %5195 = vmatpush3.bf16.msra.mxu0 %v5731_v60  ;;  %v5791_v60 = vld [vmem:[#allocation4 + $0x4a0] sm:$0xff]  }
  0x85   :  { %5196 = vmatprep.subr.bf16.mxu0 %v5733_v62  ;;  %v5790_v62 = vld [vmem:[#allocation4 + $0x428] sm:$0xff]  }
  0x86   :  { %5171 = vmatpush3.bf16.msra.mxu1 %v5730_v59  ;;  %v5788_v59 = vld [vmem:[#allocation4 + $0x468] sm:$0xff]  }
  0x87   :  { %5172 = vmatprep.subr.bf16.mxu1 %v5732_v1  ;;  %v5795_v1 = vld [vmem:[#allocation4 + $0x498] sm:$0xff]  }
  0x88   :  { %5197 = vmatpush3.bf16.msra.mxu0 %v5735_v2  ;;  %v5797_v2 = vld [vmem:[#allocation4 + $0x4d0] sm:$0xff]  }
  0x89   :  { %5226 = vmatprep.subr.bf16.mxu0 %v5739_v4  ;;  %v5796_v4 = vld [vmem:[#allocation4 + $0x458] sm:$0xff]  }
  0x8a   :  { %5173 = vmatpush3.bf16.msra.mxu1 %v5734_v6  ;;  %v5801_v6 = vld [vmem:[#allocation4 + $0x4c8] sm:$0xff]  }
  0x8b   :  { %5174 = vmatprep.subr.bf16.mxu1 %v5736_v7  ;;  %2905 = vmatmul.mubr.bf16.vlgmr.msra.gmra.mxu0 %v4724_v8  ;;  %v5798_v7 = vld [vmem:[#allocation4 + $0x418] sm:$0xff]   ;;  %v5800_v8 = vld [vmem:[#allocation4 + $0x450] sm:$0xff]  }
  0x8c   :  { %5227 = vmatpush3.bf16.msra.mxu0 %v5741_v9  ;;  %2984 = vmatprep.mubr.bf16.mxu0 %v4729_v38  ;;  %v5802_v9 = vld [vmem:[#allocation4 + $0x410] sm:$0xff]   ;;  %v5828_v38 = vld [vmem:[#allocation4 + $0x560] sm:$0xff]  }
  0x8d   :  { %5228 = vmatprep.subr.bf16.mxu0 %v5745_v10  ;;  %v5803_v10 = vld [vmem:[#allocation4 + $0x488] sm:$0xff]  }
  0x8e   :  { %5175 = vmatpush3.bf16.msra.mxu1 %v5740_v11  ;;  %v5805_v11 = vld [vmem:[#allocation4 + $0x4c0] sm:$0xff]  }
  0x8f   :  { %5204 = vmatprep.subr.bf16.mxu1 %v5744_v12  ;;  %v498_v12 = vld [vmem:[%s6714_s1 + $0x48] sm:$0xff] }
  0x90   :  { %5229 = vmatpush3.bf16.msra.mxu0 %v5747_v13  ;;  %v5804_v13 = vld [vmem:[#allocation4 + $0x448] sm:$0xff]  }
  0x91   :  { %2865 = vmatmul.mubr.bf16.vlgmr.msra.gmra.mxu1 %v4722_v14  ;;  %5230 = vmatprep.subr.bf16.mxu0 %v5749_v15  ;;  %v4733_v14 = vcombine.high %v498_v12, %v498_v12  ;;  %v5807_v15 = vld [vmem:[#allocation4 + $0x480] sm:$0xff]  }
  0x92   :  { %5205 = vmatpush3.bf16.msra.mxu1 %v5746_v16  ;;  %2944 = vmatprep.mubr.bf16.mxu1 %v4727_v43  ;;  %v5811_v16 = vld [vmem:[#allocation4 + $0x5f8] sm:$0xff]  }
  0x93   :  { %5206 = vmatprep.subr.bf16.mxu1 %v5748_v17  ;;  %v497_v17 = vld [vmem:[%s6714_s1 + $0x40] sm:$0xff] }
  0x94   :  { %5231 = vmatpush3.bf16.msra.mxu0 %v5751_v18  ;;  %v5806_v18 = vld [vmem:[#allocation4 + $0x408] sm:$0xff]  }
  0x95   :  { %5232 = vmatprep.subr.bf16.mxu0 %v5753_v19  ;;  %v4731_v19 = vcombine.high %v497_v17, %v497_v17 }
  0x96   :  { %5207 = vmatpush3.bf16.msra.mxu1 %v5750_v20  ;;  %v5808_v20 = vld [vmem:[#allocation4 + $0x440] sm:$0xff]  }
  0x97   :  { %5208 = vmatprep.subr.bf16.mxu1 %v5752_v21  ;;  %v4732_v21 = vcombine.low %v498_v12, %v498_v12  ;;  %v5849_v12 = vld [vmem:[#allocation4 + $0x6b8] sm:$0xff]  }
  0x98   :  { %5233 = vmatpush3.bf16.msra.mxu0 %v5755_v22  ;;  %v5813_v22 = vld [vmem:[#allocation4 + $0x5b8] sm:$0xff]  }
  0x99   :  { %5234 = vmatprep.subr.bf16.mxu0 %v5757_v23  ;;  %v5817_v23 = vld [vmem:[#allocation4 + $0x5f0] sm:$0xff]  }
  0x9a   :  { %5209 = vmatpush3.bf16.msra.mxu1 %v5754_v24  ;;  %v5812_v24 = vld [vmem:[#allocation4 + $0x400] sm:$0xff]  }
  0x9b   :  { %5210 = vmatprep.subr.bf16.mxu1 %v5756_v25  ;;  %v5816_v25 = vld [vmem:[#allocation4 + $0x578] sm:$0xff]  }
  0x9c   :  { %5235 = vmatpush3.bf16.msra.mxu0 %v5759_v26  ;;  %v5819_v26 = vld [vmem:[#allocation4 + $0x5b0] sm:$0xff]  }
  0x9d   :  { %5236 = vmatprep.subr.bf16.mxu0 %v5761_v27  ;;  %v4730_v27 = vcombine.low %v497_v17, %v497_v17 }
  0x9e   :  { %5211 = vmatpush3.bf16.msra.mxu1 %v5758_v28  ;;  %v5821_v28 = vld [vmem:[#allocation4 + $0x5e8] sm:$0xff]  }
  0x9f   :  { %5212 = vmatprep.subr.bf16.mxu1 %v5760_v29  ;;  %v5818_v29 = vld [vmem:[#allocation4 + $0x538] sm:$0xff]  }
  0xa0   :  { %5237 = vmatpush3.bf16.msra.mxu0 %v5763_v30  ;;  %v5820_v30 = vld [vmem:[#allocation4 + $0x570] sm:$0xff]  }
  0xa1   :  { %5238 = vmatprep.subr.bf16.mxu0 %v5765_v31  ;;  %v5823_v31 = vld [vmem:[#allocation4 + $0x5a8] sm:$0xff]  }
  0xa2   :  { %5213 = vmatpush3.bf16.msra.mxu1 %v5762_v32  ;;  %v5825_v32 = vld [vmem:[#allocation4 + $0x5e0] sm:$0xff]  }
  0xa3   :  { %5214 = vmatprep.subr.bf16.mxu1 %v5764_v33  ;;  %v5822_v33 = vld [vmem:[#allocation4 + $0x530] sm:$0xff]  }
  0xa4   :  { %5239 = vmatpush3.bf16.msra.mxu0 %v5767_v34  ;;  %v5824_v34 = vld [vmem:[#allocation4 + $0x568] sm:$0xff]  }
  0xa5   :  { %5240 = vmatprep.subr.bf16.mxu0 %v5769_v35  ;;  %v5827_v35 = vld [vmem:[#allocation4 + $0x5a0] sm:$0xff]  }
  0xa6   :  { %5215 = vmatpush3.bf16.msra.mxu1 %v5766_v37  ;;  %v5826_v37 = vld [vmem:[#allocation4 + $0x528] sm:$0xff]  }
  0xa7   :  { %5216 = vmatprep.subr.bf16.mxu1 %v5768_v39  ;;  %v5831_v39 = vld [vmem:[#allocation4 + $0x598] sm:$0xff]  }
  0xa8   :  { %5241 = vmatpush3.bf16.msra.mxu0 %v5771_v40 }
  0xa9   :  { %5270 = vmatprep.subr.bf16.mxu0 %v5775_v42  ;;  %v5830_v42 = vld [vmem:[#allocation4 + $0x520] sm:$0xff]  }
  0xaa   :  { %5217 = vmatpush3.bf16.msra.mxu1 %v5770_v44 }
  0xab   :  { %5218 = vmatprep.subr.bf16.mxu1 %v5772_v45  ;;  %2985 = vmatmul.mubr.bf16.vlgmr.msra.gmra.mxu0 %v4728_v46  ;;  %v5832_v45 = vld [vmem:[#allocation4 + $0x558] sm:$0xff]   ;;  %v5835_v46 = vld [vmem:[#allocation4 + $0x590] sm:$0xff]  }
  0xac   :  { %5271 = vmatpush3.bf16.msra.mxu0 %v5777_v47  ;;  %3064 = vmatprep.mubr.bf16.mxu0 %v4733_v14 }
  0xad   :  { %5272 = vmatprep.subr.bf16.mxu0 %v5781_v48 }
  0xae   :  { %5219 = vmatpush3.bf16.msra.mxu1 %v5776_v49  ;;  %v5837_v49 = vld [vmem:[#allocation4 + $0x5c8] sm:$0xff]  }
  0xaf   :  { %5248 = vmatprep.subr.bf16.mxu1 %v5780_v50  ;;  %v5834_v50 = vld [vmem:[#allocation4 + $0x518] sm:$0xff]  }
  0xb0   :  { %5273 = vmatpush3.bf16.msra.mxu0 %v5783_v51 }
  0xb1   :  { %2945 = vmatmul.mubr.bf16.vlgmr.msra.gmra.mxu1 %v4726_v52  ;;  %5274 = vmatprep.subr.bf16.mxu0 %v5785_v53  ;;  %v5836_v53 = vld [vmem:[#allocation4 + $0x550] sm:$0xff]  }
  0xb2   :  { %5249 = vmatpush3.bf16.msra.mxu1 %v5782_v54  ;;  %3024 = vmatprep.mubr.bf16.mxu1 %v4731_v19  ;;  %v5839_v54 = vld [vmem:[#allocation4 + $0x588] sm:$0xff]   ;;  %v5852_v19 = vld [vmem:[#allocation4 + $0x678] sm:$0xff]  }
  0xb3   :  { %5250 = vmatprep.subr.bf16.mxu1 %v5784_v55 }
  0xb4   :  { %5275 = vmatpush3.bf16.msra.mxu0 %v5787_v56 }
  0xb5   :  { %5276 = vmatprep.subr.bf16.mxu0 %v5789_v57  ;;  %v5841_v57 = vld [vmem:[#allocation4 + $0x5c0] sm:$0xff]  }
  0xb6   :  { %5251 = vmatpush3.bf16.msra.mxu1 %v5786_v58  ;;  %v5838_v58 = vld [vmem:[#allocation4 + $0x510] sm:$0xff]  }
  0xb7   :  { %5252 = vmatprep.subr.bf16.mxu1 %v5788_v59  ;;  %v500_v59 = vld [vmem:[%s6714_s1 + $0x58] sm:$0xff] }
  0xb8   :  { %5277 = vmatpush3.bf16.msra.mxu0 %v5791_v60 }
  0xb9   :  { %5278 = vmatprep.subr.bf16.mxu0 %v5793_v61 }
  0xba   :  { %5253 = vmatpush3.bf16.msra.mxu1 %v5790_v62  ;;  %v5840_v62 = vld [vmem:[#allocation4 + $0x548] sm:$0xff]  }
  0xbb   :  { %5254 = vmatprep.subr.bf16.mxu1 %v5792_v63  ;;  %v4737_v63 = vcombine.high %v500_v59, %v500_v59 }
  0xbc   :  { %5279 = vmatpush3.bf16.msra.mxu0 %v5795_v1  ;;  %v5842_v1 = vld [vmem:[#allocation4 + $0x508] sm:$0xff]  }
  0xbd   :  { %5280 = vmatprep.subr.bf16.mxu0 %v5797_v2  ;;  %v5843_v2 = vld [vmem:[#allocation4 + $0x580] sm:$0xff]  }
  0xbe   :  { %5255 = vmatpush3.bf16.msra.mxu1 %v5794_v3 }
  0xbf   :  { %5256 = vmatprep.subr.bf16.mxu1 %v5796_v4 }
  0xc0   :  { %5281 = vmatpush3.bf16.msra.mxu0 %v5799_v5  ;;  %v5847_v5 = vld [vmem:[#allocation4 + $0x6f8] sm:$0xff]  }
  0xc1   :  { %5282 = vmatprep.subr.bf16.mxu0 %v5801_v6  ;;  %v499_v6 = vld [vmem:[%s6714_s1 + $0x50] sm:$0xff] }
  0xc2   :  { %5257 = vmatpush3.bf16.msra.mxu1 %v5798_v7 }
  0xc3   :  { %5258 = vmatprep.subr.bf16.mxu1 %v5800_v8 }
  0xc4   :  { %5283 = vmatpush3.bf16.msra.mxu0 %v5803_v10  ;;  %v4736_v10 = vcombine.low %v500_v59, %v500_v59 }
  0xc5   :  { %5284 = vmatprep.subr.bf16.mxu0 %v5805_v11  ;;  %v4735_v11 = vcombine.high %v499_v6, %v499_v6 }
  0xc6   :  { %5259 = vmatpush3.bf16.msra.mxu1 %v5802_v9  ;;  %v5844_v9 = vld [vmem:[#allocation4 + $0x540] sm:$0xff]  }
  0xc7   :  { %5260 = vmatprep.subr.bf16.mxu1 %v5804_v13 }
  0xc8   :  { %5285 = vmatpush3.bf16.msra.mxu0 %v5807_v15  ;;  %v5853_v15 = vld [vmem:[#allocation4 + $0x6f0] sm:$0xff]  }
  0xc9   :  { %5314 = vmatprep.subr.bf16.mxu0 %v5811_v16  ;;  %v5848_v16 = vld [vmem:[#allocation4 + $0x500] sm:$0xff]  }
  0xca   :  { %5261 = vmatpush3.bf16.msra.mxu1 %v5806_v18 }
  0xcb   :  { %5262 = vmatprep.subr.bf16.mxu1 %v5808_v20  ;;  %3065 = vmatmul.mubr.bf16.vlgmr.msra.gmra.mxu0 %v4732_v21  ;;  %v5855_v20 = vld [vmem:[#allocation4 + $0x6b0] sm:$0xff]  }
  0xcc   :  { %5315 = vmatpush3.bf16.msra.mxu0 %v5813_v22  ;;  %3144 = vmatprep.mubr.bf16.mxu0 %v4737_v63  ;;  %v501_v63 = vld [vmem:[%s6714_s1 + $0x60] sm:$0xff] }
  0xcd   :  { %5316 = vmatprep.subr.bf16.mxu0 %v5817_v23  ;;  %v4734_v23 = vcombine.low %v499_v6, %v499_v6  ;;  %v5884_v6 = vld [vmem:[#allocation4 + $0x600] sm:$0xff]  }
  0xce   :  { %5263 = vmatpush3.bf16.msra.mxu1 %v5812_v24  ;;  %v5857_v24 = vld [vmem:[#allocation4 + $0x6e8] sm:$0xff]  }
  0xcf   :  { %5292 = vmatprep.subr.bf16.mxu1 %v5816_v25  ;;  %v5854_v25 = vld [vmem:[#allocation4 + $0x638] sm:$0xff]  }
  0xd0   :  { %5317 = vmatpush3.bf16.msra.mxu0 %v5819_v26 }
  0xd1   :  { %3025 = vmatmul.mubr.bf16.vlgmr.msra.gmra.mxu1 %v4730_v27  ;;  %5318 = vmatprep.subr.bf16.mxu0 %v5821_v28  ;;  %v5856_v28 = vld [vmem:[#allocation4 + $0x670] sm:$0xff]  }
  0xd2   :  { %5293 = vmatpush3.bf16.msra.mxu1 %v5818_v29  ;;  %3104 = vmatprep.mubr.bf16.mxu1 %v4735_v11  ;;  %v5859_v29 = vld [vmem:[#allocation4 + $0x6a8] sm:$0xff]   ;;  %v4738_v11 = vcombine.low %v501_v63, %v501_v63 }
  0xd3   :  { %5294 = vmatprep.subr.bf16.mxu1 %v5820_v30 }
  0xd4   :  { %5319 = vmatpush3.bf16.msra.mxu0 %v5823_v31 }
  0xd5   :  { %5320 = vmatprep.subr.bf16.mxu0 %v5825_v32  ;;  %v5861_v32 = vld [vmem:[#allocation4 + $0x6e0] sm:$0xff]  }
  0xd6   :  { %5295 = vmatpush3.bf16.msra.mxu1 %v5822_v33  ;;  %v5858_v33 = vld [vmem:[#allocation4 + $0x630] sm:$0xff]  }
  0xd7   :  { %5296 = vmatprep.subr.bf16.mxu1 %v5824_v34 }
  0xd8   :  { %5321 = vmatpush3.bf16.msra.mxu0 %v5827_v35  ;;  %v5860_v35 = vld [vmem:[#allocation4 + $0x668] sm:$0xff]  }
  0xd9   :  { %v6254_v40 = vpop.f32.mrf.mxu1  ;;  %5322 = vmatprep.subr.bf16.mxu0 %v5829_v36  ;;  %v6256_v44 = vpop.f32.mrf.mxu0  ;;  %v5863_v36 = vld [vmem:[#allocation4 + $0x6a0] sm:$0xff]  }
  0xda   :  { %5297 = vmatpush3.bf16.msra.mxu1 %v5826_v37 }
  0xdb   :  { %v5471_v43 = vpop.f32.mrf.mxu1  ;;  %5298 = vmatprep.subr.bf16.mxu1 %v5828_v38  ;;  %v5487_v48 = vpop.f32.mrf.mxu0  ;;  %v5865_v38 = vld [vmem:[#allocation4 + $0x6d8] sm:$0xff]  }
  0xdc   :  { %5323 = vmatpush3.bf16.msra.mxu0 %v5831_v39  ;;  %v5862_v39 = vld [vmem:[#allocation4 + $0x628] sm:$0xff]   ;;  %v5867_v43 = vld [vmem:[#allocation4 + $0x698] sm:$0xff]   ;;  %v5871_v48 = vld [vmem:[#allocation4 + $0x690] sm:$0xff]  }
  0xdd   :  { %v113_v47 = vpop.f32.mrf.mxu1  ;;  %5324 = vmatprep.subr.bf16.mxu0 %v5833_v41  ;;  %v237_v52 = vpop.f32.mrf.mxu0 }
  0xde   :  { %5299 = vmatpush3.bf16.msra.mxu1 %v5830_v42  ;;  %v5864_v42 = vld [vmem:[#allocation4 + $0x660] sm:$0xff]   ;;  %v5868_v47 = vld [vmem:[#allocation4 + $0x658] sm:$0xff]   ;;  %v5875_v52 = vld [vmem:[#allocation4 + $0x688] sm:$0xff]  }
  0xdf   :  { %v5472_v51 = vpop.f32.mrf.mxu1  ;;  %5300 = vmatprep.subr.bf16.mxu1 %v5832_v45  ;;  %v5488_v56 = vpop.f32.mrf.mxu0  ;;  %v5869_v45 = vld [vmem:[#allocation4 + $0x6d0] sm:$0xff]  }
  0xe0   :  { %5325 = vmatpush3.bf16.msra.mxu0 %v5835_v46  ;;  %v5866_v46 = vld [vmem:[#allocation4 + $0x620] sm:$0xff]   ;;  %v5872_v51 = vld [vmem:[#allocation4 + $0x650] sm:$0xff]   ;;  %v5876_v56 = vld [vmem:[#allocation4 + $0x648] sm:$0xff]  }
  0xe1   :  { %v6258_v55 = vpop.f32.mrf.mxu1  ;;  %5326 = vmatprep.subr.bf16.mxu0 %v5837_v49  ;;  %v5873_v49 = vld [vmem:[#allocation4 + $0x6c8] sm:$0xff]  }
  0xe2   :  { %5301 = vmatpush3.bf16.msra.mxu1 %v5834_v50  ;;  %v5870_v50 = vld [vmem:[#allocation4 + $0x618] sm:$0xff]  }
  0xe3   :  { %v5479_v60 = vpop.f32.mrf.mxu1  ;;  %5302 = vmatprep.subr.bf16.mxu1 %v5836_v53  ;;  %v6263_v61 = vpop.f32.mrf.mxu0  ;;  %v5877_v53 = vld [vmem:[#allocation4 + $0x6c0] sm:$0xff]  }
  0xe4   :  { %5327 = vmatpush3.bf16.msra.mxu0 %v5839_v54  ;;  %v5874_v54 = vld [vmem:[#allocation4 + $0x610] sm:$0xff]   ;;  %v5883_v60 = vld [vmem:[#allocation4 + $0x7f8] sm:$0xff]  }
  0xe5   :  { %v175_v3 = vpop.f32.mrf.mxu1  ;;  %v5503_v4 = vpop.f32.mrf.mxu0  ;;  %5328 = vmatprep.subr.bf16.mxu0 %v5841_v57  ;;  %v502_v57 = vld [vmem:[%s6714_s1 + $0x68] sm:$0xff] }
  0xe6   :  { %5303 = vmatpush3.bf16.msra.mxu1 %v5838_v58  ;;  %v5879_v58 = vld [vmem:[#allocation4 + $0x680] sm:$0xff]   ;;  %v4741_v59 = vcombine.high %v502_v57, %v502_v57  ;;  %v4739_v3 = vcombine.high %v501_v63, %v501_v63  ;;  %v5885_v4 = vld [vmem:[#allocation4 + $0x7b8] sm:$0xff]  }
  0xe7   :  { %v5480_v7 = vpop.f32.mrf.mxu1  ;;  %5304 = vmatprep.subr.bf16.mxu1 %v5840_v62  ;;  %v361_v8 = vpop.f32.mrf.mxu0  ;;  %v5878_v62 = vld [vmem:[#allocation4 + $0x608] sm:$0xff]   ;;  %v6295_v63 = vld [vmem:[%s6717_s4 + $0x18] sm:$0xff] }
  0xe8   :  { %5329 = vmatpush3.bf16.msra.mxu0 %v5843_v2  ;;  %v4740_v2 = vcombine.low %v502_v57, %v502_v57  ;;  %v5888_v8 = vld [vmem:[#allocation4 + $0x778] sm:$0xff]  }
  0xe9   :  { %v6268_v13 = vpop.f32.mrf.mxu1  ;;  %v5504_v14 = vpop.f32.mrf.mxu0  ;;  %5358 = vmatprep.subr.bf16.mxu0 %v5847_v5  ;;  %v5889_v5 = vld [vmem:[#allocation4 + $0x7f0] sm:$0xff]  }
  0xea   :  { %5305 = vmatpush3.bf16.msra.mxu1 %v5842_v1  ;;  %v5880_v1 = vld [vmem:[#allocation4 + $0x640] sm:$0xff]  }
  0xeb   :  { %v5495_v17 = vpop.f32.mrf.mxu1  ;;  %5306 = vmatprep.subr.bf16.mxu1 %v5844_v9  ;;  %v6270_v18 = vpop.f32.mrf.mxu0  ;;  %3145 = vmatmul.mubr.bf16.vlgmr.msra.gmra.mxu0 %v4736_v10  ;;  %v5891_v9 = vld [vmem:[#allocation4 + $0x7b0] sm:$0xff]  }
  0xec   :  { %5359 = vmatpush3.bf16.msra.mxu0 %v5849_v12  ;;  %3224 = vmatprep.mubr.bf16.mxu0 %v4741_v59  ;;  %v5893_v12 = vld [vmem:[#allocation4 + $0x7e8] sm:$0xff]   ;;  %v5892_v17 = vld [vmem:[#allocation4 + $0x770] sm:$0xff]   ;;  %v5918_v59 = vld [vmem:[#allocation4 + $0x740] sm:$0xff]  }
  0xed   :  { %v299_v21 = vpop.f32.mrf.mxu1  ;;  %v5519_v22 = vpop.f32.mrf.mxu0  ;;  %5360 = vmatprep.subr.bf16.mxu0 %v5853_v15  ;;  %v5890_v15 = vld [vmem:[#allocation4 + $0x738] sm:$0xff]  }
  0xee   :  { %5307 = vmatpush3.bf16.msra.mxu1 %v5848_v16  ;;  %v4713_v21 = vld [vmem:[%s6718_s5] ss:$0 sm:$0xff] }
  0xef   :  { %v5496_v26 = vpop.f32.mrf.mxu1  ;;  %5336 = vmatprep.subr.bf16.mxu1 %v5852_v19  ;;  %v485_v27 = vpop.f32.mrf.mxu0  ;;  %v5895_v19 = vld [vmem:[#allocation4 + $0x7a8] sm:$0xff]  }
  0xf0   :  { %5361 = vmatpush3.bf16.msra.mxu0 %v5855_v20  ;;  %v5896_v26 = vld [vmem:[#allocation4 + $0x768] sm:$0xff]  }
  0xf1   :  { %v6272_v30 = vpop.f32.mrf.mxu1  ;;  %3105 = vmatmul.mubr.bf16.vlgmr.msra.gmra.mxu1 %v4734_v23  ;;  %v5520_v31 = vpop.f32.mrf.mxu0  ;;  %5362 = vmatprep.subr.bf16.mxu0 %v5857_v24  ;;  %v5897_v23 = vld [vmem:[#allocation4 + $0x7e0] sm:$0xff]   ;;  %v5894_v24 = vld [vmem:[#allocation4 + $0x730] sm:$0xff]  }
  0xf2   :  { %5337 = vmatpush3.bf16.msra.mxu1 %v5854_v25  ;;  %3184 = vmatprep.mubr.bf16.mxu1 %v4739_v3  ;;  %v5901_v31 = vld [vmem:[#allocation4 + $0x7d8] sm:$0xff]  }
  0xf3   :  { %v5511_v34 = vpop.f32.mrf.mxu1  ;;  %5338 = vmatprep.subr.bf16.mxu1 %v5856_v28  ;;  %v5899_v28 = vld [vmem:[#allocation4 + $0x7a0] sm:$0xff]   ;;  %v6303_v3 = vld [vmem:[%s6717_s4 + $0x10] sm:$0xff] }
  0xf4   :  { %5363 = vmatpush3.bf16.msra.mxu0 %v5859_v29 }
  0xf5   :  { %v423_v37 = vpop.f32.mrf.mxu1  ;;  %5364 = vmatprep.subr.bf16.mxu0 %v5861_v32 }
  0xf6   :  { %5339 = vmatpush3.bf16.msra.mxu1 %v5858_v33  ;;  %v5898_v33 = vld [vmem:[#allocation4 + $0x728] sm:$0xff]  }
  0xf7   :  { %v5512_v41 = vpop.f32.mrf.mxu1  ;;  %5340 = vmatprep.subr.bf16.mxu1 %v5860_v35  ;;  %v5900_v35 = vld [vmem:[#allocation4 + $0x760] sm:$0xff]  }
  0xf8   :  { %5365 = vmatpush3.bf16.msra.mxu0 %v5863_v36  ;;  %v5903_v36 = vld [vmem:[#allocation4 + $0x798] sm:$0xff]  }
  0xf9   :  { %5366 = vmatprep.subr.bf16.mxu0 %v5865_v38  ;;  %v5905_v38 = vld [vmem:[#allocation4 + $0x7d0] sm:$0xff]   ;;  %v5904_v41 = vld [vmem:[#allocation4 + $0x758] sm:$0xff]  }
  0xfa   :  { %5341 = vmatpush3.bf16.msra.mxu1 %v5862_v39  ;;  %v5902_v39 = vld [vmem:[#allocation4 + $0x720] sm:$0xff]  }
  0xfb   :  { %5342 = vmatprep.subr.bf16.mxu1 %v5864_v42  ;;  %v5907_v42 = vld [vmem:[#allocation4 + $0x790] sm:$0xff]  }
  0xfc   :  { %5367 = vmatpush3.bf16.msra.mxu0 %v5867_v43  ;;  %v5909_v43 = vld [vmem:[#allocation4 + $0x7c8] sm:$0xff]  }
  0xfd   :  { %5368 = vmatprep.subr.bf16.mxu0 %v5869_v45  ;;  %v5906_v45 = vld [vmem:[#allocation4 + $0x718] sm:$0xff]  }
  0xfe   :  { %5343 = vmatpush3.bf16.msra.mxu1 %v5866_v46  ;;  %v5908_v46 = vld [vmem:[#allocation4 + $0x750] sm:$0xff]  }
  0xff   :  { %5344 = vmatprep.subr.bf16.mxu1 %v5868_v47  ;;  %v5911_v47 = vld [vmem:[#allocation4 + $0x788] sm:$0xff]  }
 0x100   :  { %5369 = vmatpush3.bf16.msra.mxu0 %v5871_v48  ;;  %v5913_v48 = vld [vmem:[#allocation4 + $0x7c0] sm:$0xff]  }
 0x101   :  { %5370 = vmatprep.subr.bf16.mxu0 %v5873_v49  ;;  %v5910_v49 = vld [vmem:[#allocation4 + $0x710] sm:$0xff]  }
 0x102   :  { %5345 = vmatpush3.bf16.msra.mxu1 %v5870_v50  ;;  %v5912_v50 = vld [vmem:[#allocation4 + $0x748] sm:$0xff]  }
 0x103   :  { %5346 = vmatprep.subr.bf16.mxu1 %v5872_v51  ;;  %v504_v51 = vld [vmem:[%s6714_s1 + $0x78] sm:$0xff] }
 0x104   :  { %5371 = vmatpush3.bf16.msra.mxu0 %v5875_v52  ;;  %v5915_v52 = vld [vmem:[#allocation4 + $0x780] sm:$0xff]  }
 0x105   :  { %5372 = vmatprep.subr.bf16.mxu0 %v5877_v53  ;;  %v4745_v53 = vcombine.high %v504_v51, %v504_v51 }
 0x106   :  { %5347 = vmatpush3.bf16.msra.mxu1 %v5874_v54  ;;  %v503_v54 = vld [vmem:[%s6714_s1 + $0x70] sm:$0xff] }
 0x107   :  { %5348 = vmatprep.subr.bf16.mxu1 %v5876_v56  ;;  %v5914_v56 = vld [vmem:[#allocation4 + $0x708] sm:$0xff]   ;;  %v4743_v57 = vcombine.high %v503_v54, %v503_v54 }
 0x108   :  { %5373 = vmatpush3.bf16.msra.mxu0 %v5879_v58  ;;  %v4744_v58 = vcombine.low %v504_v51, %v504_v51 }
 0x109   :  { %5402 = vmatprep.subr.bf16.mxu0 %v5883_v60  ;;  %v5919_v60 = vld [vmem:[#allocation4 + $0x700] sm:$0xff]  }
 0x10a   :  { %5349 = vmatpush3.bf16.msra.mxu1 %v5878_v62 }
 0x10b   :  { %5350 = vmatprep.subr.bf16.mxu1 %v5880_v1  ;;  %v5110_v7 = vpop.f32.mrf.mxu0  ;;  %3225 = vmatmul.mubr.bf16.vlgmr.msra.gmra.mxu0 %v4740_v2  ;;  %v4742_v2 = vcombine.low %v503_v54, %v503_v54 }
 0x10c   :  { %5403 = vmatpush3.bf16.msra.mxu0 %v5885_v4  ;;  %3304 = vmatprep.mubr.bf16.mxu0 %v4745_v53 }
 0x10d   :  { %v5111_v10 = vpop.f32.mrf.mxu0  ;;  %5404 = vmatprep.subr.bf16.mxu0 %v5889_v5 }
 0x10e   :  { %5351 = vmatpush3.bf16.msra.mxu1 %v5884_v6  ;;  %v5112_v14 = vadd.f32 %v5111_v10, %v5110_v7  ;;  %v6311_v6 = vld [vmem:[%s6717_s4 + $0x8] sm:$0xff] }
 0x10f   :  { %5380 = vmatprep.subr.bf16.mxu1 %v5888_v8  ;;  %v5113_v16 = vpop.f32.mrf.mxu0 }
 0x110   :  { %5405 = vmatpush3.bf16.msra.mxu0 %v5891_v9  ;;  %v6320_v9 = vld [vmem:[%s6717_s4] sm:$0xff] }
 0x111   :  { %v5088_v20 = vpop.f32.mrf.mxu1  ;;  %3185 = vmatmul.mubr.bf16.vlgmr.msra.gmra.mxu1 %v4738_v11  ;;  %v5114_v22 = vpop.f32.mrf.mxu0  ;;  %5406 = vmatprep.subr.bf16.mxu0 %v5893_v12 }
 0x112   :  { %5381 = vmatpush3.bf16.msra.mxu1 %v5890_v15  ;;  %3264 = vmatprep.mubr.bf16.mxu1 %v4743_v57  ;;  %v3321_v15 = vld [vmem:[%s6721_s8] sm:$0xff] }
 0x113   :  { %v5089_v25 = vpop.f32.mrf.mxu1  ;;  %5382 = vmatprep.subr.bf16.mxu1 %v5892_v17 }
 0x114   :  { %v5090_v27 = vadd.f32 %v5089_v25, %v5088_v20  ;;  %5407 = vmatpush3.bf16.msra.mxu0 %v5895_v19 }
 0x115   :  { %v5091_v29 = vpop.f32.mrf.mxu1  ;;  %5408 = vmatprep.subr.bf16.mxu0 %v5897_v23 }
 0x116   :  { %v2707_v32 = vadd.f32 %v5090_v27, %v4713_v21  ;;  %5383 = vmatpush3.bf16.msra.mxu1 %v5894_v24 }
 0x117   :  { %v5092_v34 = vpop.f32.mrf.mxu1  ;;  %5384 = vmatprep.subr.bf16.mxu1 %v5896_v26 }
 0x118   :  { %5409 = vmatpush3.bf16.msra.mxu0 %v5899_v28  ;;  %v6283_v37 = vadd.f32 %v5112_v14, %v2707_v32 }
 0x119   :  { %5410 = vmatprep.subr.bf16.mxu0 %v5901_v31 }
 0x11a   :  { %5385 = vmatpush3.bf16.msra.mxu1 %v5898_v33 }
 0x11b   :  { %5386 = vmatprep.subr.bf16.mxu1 %v5900_v35 }
 0x11c   :  { %5411 = vmatpush3.bf16.msra.mxu0 %v5903_v36 }
 0x11d   :  { %5412 = vmatprep.subr.bf16.mxu0 %v5905_v38 }
 0x11e   :  { %5387 = vmatpush3.bf16.msra.mxu1 %v5902_v39 }
 0x11f   :  { %5388 = vmatprep.subr.bf16.mxu1 %v5904_v41 }
 0x120   :  { %5413 = vmatpush3.bf16.msra.mxu0 %v5907_v42 }
 0x121   :  { %5414 = vmatprep.subr.bf16.mxu0 %v5909_v43 }
 0x122   :  { %5389 = vmatpush3.bf16.msra.mxu1 %v5906_v45 }
 0x123   :  { %5390 = vmatprep.subr.bf16.mxu1 %v5908_v46 }
 0x124   :  { %5415 = vmatpush3.bf16.msra.mxu0 %v5911_v47 }
 0x125   :  { %5416 = vmatprep.subr.bf16.mxu0 %v5913_v48 }
 0x126   :  { %5391 = vmatpush3.bf16.msra.mxu1 %v5910_v49 }
 0x127   :  { %5392 = vmatprep.subr.bf16.mxu1 %v5912_v50 }
 0x128   :  { %5417 = vmatpush3.bf16.msra.mxu0 %v5915_v52 }
 0x129   :  { %5532 = vmatprep.subr.mxu0 %v6049_v0 }
 0x12a   :  { %5393 = vmatpush3.bf16.msra.mxu1 %v5914_v56 }
 0x12b   :  { %5394 = vmatprep.subr.bf16.mxu1 %v5918_v59  ;;  %3305 = vmatmul.mubr.bf16.vlgmr.msra.gmra.mxu0 %v4744_v58  ;;  %v5154_v62 = vpop.f32.mrf.mxu0 }
 0x12c   :  { %5533 = vmatpush3.msra.mxu0 %v6295_v63  ;;  %5540 = vmatprep.mubr.msk.f32.mxu0 %vm6050_vm0, %v6049_v0 }
 0x12d   :  { %v5155_v1 = vpop.f32.mrf.mxu0  ;;  %5534 = vmatprep.subr.mxu0 %v6049_v0 }
 0x12e   :  { %5395 = vmatpush3.bf16.msra.mxu1 %v5919_v60  ;;  %v5156_v4 = vadd.f32 %v5155_v1, %v5154_v62  ;;  %5535 = vmatpush3.msra.mxu0 %v6303_v3 }
 0x12f   :  { %5521 = vmatprep.subr.mxu1 %v6049_v0  ;;  %v5157_v5 = vpop.f32.mrf.mxu0  ;;  %5536 = vmatprep.subr.mxu0 %v6049_v0 }
 0x130   :  { %5537 = vmatpush3.msra.mxu0 %v6311_v6 }
 0x131   :  { %v5132_v7 = vpop.f32.mrf.mxu1  ;;  %3265 = vmatmul.mubr.bf16.vlgmr.msra.gmra.mxu1 %v4742_v2  ;;  %v5158_v8 = vpop.f32.mrf.mxu0  ;;  %5538 = vmatprep.subr.mxu0 %v6049_v0 }
 0x132   :  { %5522 = vmatpush3.msra.mxu1 %v6295_v63  ;;  %5529 = vmatprep.mubr.msk.f32.mxu1 %vm6050_vm0, %v6049_v0 }
 0x133   :  { %v5133_v10 = vpop.f32.mrf.mxu1  ;;  %5523 = vmatprep.subr.mxu1 %v6049_v0  ;;  %5539 = vmatpush3.msra.mxu0 %v6320_v9 }
 0x134   :  { %v5134_v11 = vadd.f32 %v5133_v10, %v5132_v7  ;;  %5524 = vmatpush3.msra.mxu1 %v6303_v3  ;;  %5554 = vmatprep.subr.mxu0 %v6049_v0 }
 0x135   :  { %v5135_v12 = vpop.f32.mrf.mxu1  ;;  %5525 = vmatprep.subr.mxu1 %v6049_v0 }
 0x136   :  { %v2787_v14 = vadd.f32 %v5134_v11, %v6283_v37  ;;  %5526 = vmatpush3.msra.mxu1 %v6311_v6 }
 0x137   :  { %v5136_v16 = vpop.f32.mrf.mxu1  ;;  %5527 = vmatprep.subr.mxu1 %v6049_v0 }
 0x138   :  { %5528 = vmatpush3.msra.mxu1 %v6320_v9  ;;  %v2827_v17 = vadd.f32 %v5156_v4, %v2787_v14 }
 0x139   :  { %5530 = vmatmul.mubr.msk.f32.vlgmr.msra.gmra.mxu1 %vm72_vm1, %v3321_v15  ;;  %5543 = vmatprep.subr.mxu1 %v6049_v0 }
 0x13a   :  { %5544 = vmatpush3.msra.mxu1 %v6295_v63  ;;  %5551 = vmatprep.mubr.msk.f32.mxu1 %vm6050_vm0, %v6049_v0 }
 0x13b   :  { %5545 = vmatprep.subr.mxu1 %v6049_v0 }
 0x13c   :  { %5546 = vmatpush3.msra.mxu1 %v6303_v3 }
 0x13d   :  { %5547 = vmatprep.subr.mxu1 %v6049_v0 }
 0x13e   :  { %5548 = vmatpush3.msra.mxu1 %v6311_v6 }
 0x13f   :  { %5549 = vmatprep.subr.mxu1 %v6049_v0 }
 0x140   :  { %5550 = vmatpush3.msra.mxu1 %v6320_v9 }
 0x141   :  { %5565 = vmatprep.subr.mxu1 %v6049_v0 }
 0x14b   :  { %v5198_v19 = vpop.f32.mrf.mxu0 }
 0x14d   :  { %v5199_v20 = vpop.f32.mrf.mxu0 }
 0x14e   :  { %v5200_v21 = vadd.f32 %v5199_v20, %v5198_v19 }
 0x14f   :  { %v5201_v22 = vpop.f32.mrf.mxu0 }
 0x151   :  { %v5176_v23 = vpop.f32.mrf.mxu1  ;;  %v5202_v24 = vpop.f32.mrf.mxu0 }
 0x153   :  { %v5177_v25 = vpop.f32.mrf.mxu1 }
 0x154   :  { %v5178_v26 = vadd.f32 %v5177_v25, %v5176_v23 }
 0x155   :  { %v5179_v27 = vpop.f32.mrf.mxu1 }
 0x156   :  { %v2867_v28 = vadd.f32 %v5178_v26, %v2827_v17 }
 0x157   :  { %v5180_v29 = vpop.f32.mrf.mxu1 }
 0x158   :  { %v2907_v31 = vadd.f32 %v5200_v21, %v2867_v28 }
 0x16b   :  { %v5242_v32 = vpop.f32.mrf.mxu0 }
 0x16d   :  { %v5243_v33 = vpop.f32.mrf.mxu0 }
 0x16e   :  { %v5244_v34 = vadd.f32 %v5243_v33, %v5242_v32 }
 0x16f   :  { %v5245_v35 = vpop.f32.mrf.mxu0 }
 0x171   :  { %v5220_v36 = vpop.f32.mrf.mxu1  ;;  %v5246_v37 = vpop.f32.mrf.mxu0 }
 0x173   :  { %v5221_v38 = vpop.f32.mrf.mxu1 }
 0x174   :  { %v5222_v39 = vadd.f32 %v5221_v38, %v5220_v36 }
 0x175   :  { %v5223_v41 = vpop.f32.mrf.mxu1 }
 0x176   :  { %v2947_v42 = vadd.f32 %v5222_v39, %v2907_v31 }
 0x177   :  { %v5224_v43 = vpop.f32.mrf.mxu1 }
 0x178   :  { %v2987_v45 = vadd.f32 %v5244_v34, %v2947_v42 }
 0x18b   :  { %v5286_v46 = vpop.f32.mrf.mxu0 }
 0x18d   :  { %v5287_v47 = vpop.f32.mrf.mxu0 }
 0x18e   :  { %v5288_v48 = vadd.f32 %v5287_v47, %v5286_v46 }
 0x18f   :  { %v5289_v49 = vpop.f32.mrf.mxu0 }
 0x190   :  { %v3316_v49 = vlaneseq }
 0x191   :  { %v5264_v50 = vpop.f32.mrf.mxu1  ;;  %v5290_v51 = vpop.f32.mrf.mxu0 }
 0x193   :  { %v5265_v52 = vpop.f32.mrf.mxu1 }
 0x194   :  { %v5266_v53 = vadd.f32 %v5265_v52, %v5264_v50  ;;  %v3317_v50 = vand.u32 127, %v3316_v49 }
 0x195   :  { %v5267_v54 = vpop.f32.mrf.mxu1 }
 0x196   :  { %v3027_v56 = vadd.f32 %v5266_v53, %v2987_v45  ;;  %vm3318_vm2 = vcmp.ge.s32.totalorder %v3317_v50, 64  ;;  %vm3319_vm3 = vcmp.lt.s32.totalorder %v3317_v50, 96  ;;  %v3322_v54 = vld [vmem:[%s6722_s9] sm:$0xff] }
 0x197   :  { %v5268_v57 = vpop.f32.mrf.mxu1  ;;  %vm6353_vm4 = vmand %vm3318_vm2, %vm3319_vm3 }
 0x198   :  { %v3067_v58 = vadd.f32 %v5288_v48, %v3027_v56 }
 0x1ab   :  { %v5330_v59 = vpop.f32.mrf.mxu0 }
 0x1ad   :  { %v5331_v60 = vpop.f32.mrf.mxu0 }
 0x1ae   :  { %v5332_v62 = vadd.f32 %v5331_v60, %v5330_v59 }
 0x1af   :  { %v5333_v1 = vpop.f32.mrf.mxu0 }
 0x1b1   :  { %v5308_v2 = vpop.f32.mrf.mxu1  ;;  %v5334_v4 = vpop.f32.mrf.mxu0 }
 0x1b3   :  { %v5309_v5 = vpop.f32.mrf.mxu1 }
 0x1b4   :  { %v5310_v7 = vadd.f32 %v5309_v5, %v5308_v2 }
 0x1b5   :  { %v5311_v8 = vpop.f32.mrf.mxu1 }
 0x1b6   :  { %v3107_v10 = vadd.f32 %v5310_v7, %v3067_v58 }
 0x1b7   :  { %v5312_v11 = vpop.f32.mrf.mxu1 }
 0x1b8   :  { %v3147_v12 = vadd.f32 %v5332_v62, %v3107_v10 }
 0x1cb   :  { %v5374_v14 = vpop.f32.mrf.mxu0 }
 0x1cd   :  { %v5375_v15 = vpop.f32.mrf.mxu0 }
 0x1ce   :  { %v5376_v27 = vadd.f32 %v5375_v15, %v5374_v14 }
 0x1cf   :  { %v5377_v16 = vpop.f32.mrf.mxu0 }
 0x1d1   :  { %v5352_v17 = vpop.f32.mrf.mxu1  ;;  %v5378_v19 = vpop.f32.mrf.mxu0 }
 0x1d3   :  { %v5353_v20 = vpop.f32.mrf.mxu1 }
 0x1d4   :  { %v5354_v24 = vadd.f32 %v5353_v20, %v5352_v17 }
 0x1d5   :  { %v5355_v21 = vpop.f32.mrf.mxu1 }
 0x1d6   :  { %v3187_v28 = vadd.f32 %v5354_v24, %v3147_v12 }
 0x1d7   :  { %v5356_v22 = vpop.f32.mrf.mxu1 }
 0x1d8   :  { %v3227_v33 = vadd.f32 %v5376_v27, %v3187_v28 }
 0x1eb   :  { %v5418_v23 = vpop.f32.mrf.mxu0 }
 0x1ed   :  { %v5419_v25 = vpop.f32.mrf.mxu0 }
 0x1ee   :  { %v5420_v36 = vadd.f32 %v5419_v25, %v5418_v23 }
 0x1ef   :  { %v5421_v26 = vpop.f32.mrf.mxu0 }
 0x1f1   :  { %v5396_v29 = vpop.f32.mrf.mxu1  ;;  %v5422_v31 = vpop.f32.mrf.mxu0 }
 0x1f3   :  { %v5397_v32 = vpop.f32.mrf.mxu1 }
 0x1f4   :  { %v5398_v34 = vadd.f32 %v5397_v32, %v5396_v29 }
 0x1f5   :  { %v5399_v35 = vpop.f32.mrf.mxu1 }
 0x1f6   :  { %v3267_v37 = vadd.f32 %v5398_v34, %v3227_v33 }
 0x1f7   :  { %v5400_v38 = vpop.f32.mrf.mxu1 }
 0x1f8   :  { %v6348_v39 = vadd.f32 %v5420_v36, %v3267_v37 }
 0x1f9   :  { %v3394_v41 = vpop.f32.mrf.mxu1 }
 0x1fa   :  { %v3324_v42 = vadd.f32 %v6348_v39, %v6254_v40  ;;  %v3435_v7 = vadd.f32 %v6348_v39, %v6258_v55  ;;  %v3542_v28 = vadd.f32 %v6348_v39, %v6256_v44 }
 0x1fb   :  { %v5531_v43 = vpop.f32.mrf.mxu1 }
 0x1fc   :  { %v3398_v45 = vadd.f32 %v3394_v41, %v3324_v42 }
 0x1fe   :  { %v5003_v46 = vmul.f32 -1.442695, %v3398_v45 }
 0x200   :  { %5924 = vpow2.f32 %v5003_v46 }
 0x201   :  { %5926 = vtanh.f32 %v3398_v45 }
 0x20d   :  { %v5925_v47 = vpop.eup %5924 }
 0x20e   :  { %v3403_v48 = vadd.f32 1.0, %v5925_v47  ;;  %v5927_v52 = vpop.eup %5926 }
 0x210   :  { %5928 = vrcp.f32 %v3403_v48 }
 0x21d   :  { %v5929_v53 = vpop.eup %5928 }
 0x21e   :  { %v3406_v40 = vsel %vm6353_vm4, %v5927_v52, %v5929_v53  ;;  %v3649_v52 = vadd.f32 %v6348_v39, %v6268_v13 }
 0x21f   :  { %3413 = vrot.lane.b32.xlu0 %v3406_v40, %s6047_s24 }
 0x223   :  { %3408 = vrot.lane.b32.xlu0 %v3322_v54, %s6051_s15 }
 0x291   :  { %v3414_v56 = vpop.permute.xlu0 %3413 }
 0x292   :  { %v3416_v57 = vmul.f32 %v3414_v56, %v3406_v40 }
 0x294   :  { %3418 = vrot.lane.b32.xlu1 %v3416_v57, %s6051_s15 }
 0x295   :  { %v3409_v58 = vpop.permute.xlu0 %3408 }
 0x296   :  { %v3411_v59 = vmul.f32 %v3409_v58, %v3406_v40 }
 0x306   :  { %v3419_v60 = vpop.permute.xlu1 %3418 }
 0x307   :  { %v3421_v62 = vadd.f32 %v3419_v60, %v3411_v59 }
 0x309   :  { %5930 = vtanh.f32 %v3421_v62 }
 0x316   :  { %v5931_v1 = vpop.eup %5930 }
 0x317   :  { %3424 = vrot.lane.b32.xlu1 %v5931_v1, %s6047_s24 }
 0x389   :  { %v3425_v2 = vpop.permute.xlu1 %3424 }
 0x38a   :  { %v3427_v4 = vmul.f32 %v3425_v2, %v3406_v40 }
 0x38c   :  { %3429 = vrot.lane.b32.xlu0 %v3427_v4, %s6051_s15 }
 0x3fe   :  { %v3430_v5 = vpop.permute.xlu0 %3429 }
 0x3ff   :  { %3432 = vst.msk [vmem:[#allocation3] sm:$0xff] %vm72_vm1, %v3430_v5  ;;  %5541 = vmatmul.mubr.msk.f32.vlgmr.msra.gmra.mxu0 %vm72_vm1, %v3430_v5 }
 0x400   :  { %5555 = vmatpush3.msra.mxu0 %v6295_v63  ;;  %5562 = vmatprep.mubr.msk.f32.mxu0 %vm6050_vm0, %v6049_v0 }
 0x401   :  { %5556 = vmatprep.subr.mxu0 %v6049_v0 }
 0x402   :  { %5557 = vmatpush3.msra.mxu0 %v6303_v3 }
 0x403   :  { %5558 = vmatprep.subr.mxu0 %v6049_v0 }
 0x404   :  { %5559 = vmatpush3.msra.mxu0 %v6311_v6 }
 0x405   :  { %5560 = vmatprep.subr.mxu0 %v6049_v0 }
 0x406   :  { %5561 = vmatpush3.msra.mxu0 %v6320_v9 }
 0x407   :  { %5576 = vmatprep.subr.mxu0 %v6049_v0 }
 0x4bf   :  { %v3504_v8 = vpop.f32.mrf.mxu0 }
 0x4c0   :  { %v3508_v10 = vadd.f32 %v3504_v8, %v3435_v7 }
 0x4c1   :  { %v5542_v11 = vpop.f32.mrf.mxu0 }
 0x4c2   :  { %v5005_v12 = vmul.f32 -1.442695, %v3508_v10 }
 0x4c4   :  { %5932 = vpow2.f32 %v5005_v12  ;;  %v3756_v12 = vadd.f32 %v6348_v39, %v6263_v61 }
 0x4c5   :  { %5934 = vtanh.f32 %v3508_v10 }
 0x4d1   :  { %v5933_v14 = vpop.eup %5932 }
 0x4d2   :  { %v3513_v15 = vadd.f32 1.0, %v5933_v14  ;;  %v5935_v16 = vpop.eup %5934 }
 0x4d4   :  { %5936 = vrcp.f32 %v3513_v15 }
 0x4e1   :  { %v5937_v17 = vpop.eup %5936 }
 0x4e2   :  { %v3516_v19 = vsel %vm6353_vm4, %v5935_v16, %v5937_v17 }
 0x4e3   :  { %3519 = vrot.lane.b32.xlu1 %v3516_v19, %s6047_s24  ;;  %v3517_v55 = vmul.f32 %v3516_v19, %v3421_v62 }
 0x555   :  { %v3520_v20 = vpop.permute.xlu1 %3519 }
 0x556   :  { %v3522_v21 = vmul.f32 %v3520_v20, %v3516_v19 }
 0x558   :  { %3524 = vrot.lane.b32.xlu0 %v3522_v21, %s6051_s15 }
 0x5ca   :  { %v3525_v22 = vpop.permute.xlu0 %3524 }
 0x5cb   :  { %v3527_v23 = vadd.f32 %v3525_v22, %v3517_v55  ;;  %v5922_v22 = vld [vmem:[%s6719_s6 + $0x8] sm:$0xff]  }
 0x5cd   :  { %5938 = vtanh.f32 %v3527_v23 }
 0x5da   :  { %v5939_v24 = vpop.eup %5938 }
 0x5db   :  { %3530 = vrot.lane.b32.xlu1 %v5939_v24, %s6047_s24 }
 0x64d   :  { %v3531_v25 = vpop.permute.xlu1 %3530 }
 0x64e   :  { %v3533_v26 = vmul.f32 %v3531_v25, %v3516_v19 }
 0x650   :  { %3535 = vrot.lane.b32.xlu0 %v3533_v26, %s6051_s15 }
 0x6c2   :  { %v3536_v27 = vpop.permute.xlu0 %3535 }
 0x6c3   :  { %3539 = vst.msk [vmem:[#allocation3 + $0x8] sm:$0xff] %vm72_vm1, %v3536_v27  ;;  %5552 = vmatmul.mubr.msk.f32.vlgmr.msra.gmra.mxu1 %vm72_vm1, %v3536_v27  ;;  %v4081_v27 = vld [vmem:[#allocation3] sm:$0xff] }
 0x6c4   :  { %5566 = vmatpush3.msra.mxu1 %v6295_v63  ;;  %5573 = vmatprep.mubr.msk.f32.mxu1 %vm6050_vm0, %v6049_v0 }
 0x6c5   :  { %5567 = vmatprep.subr.mxu1 %v6049_v0 }
 0x6c6   :  { %5568 = vmatpush3.msra.mxu1 %v6303_v3 }
 0x6c7   :  { %5569 = vmatprep.subr.mxu1 %v6049_v0 }
 0x6c8   :  { %5570 = vmatpush3.msra.mxu1 %v6311_v6 }
 0x6c9   :  { %5571 = vmatprep.subr.mxu1 %v6049_v0 }
 0x6ca   :  { %5572 = vmatpush3.msra.mxu1 %v6320_v9  ;;  %v4082_v26 = vld [vmem:[#allocation3 + $0x8] sm:$0xff] }
 0x6cb   :  { %5587 = vmatprep.subr.mxu1 %v6049_v0 }
 0x783   :  { %v3611_v29 = vpop.f32.mrf.mxu1 }
 0x784   :  { %v3615_v31 = vadd.f32 %v3611_v29, %v3542_v28  ;;  %v5923_v28 = vld [vmem:[%s6719_s6] sm:$0xff]  }
 0x785   :  { %v5553_v32 = vpop.f32.mrf.mxu1 }
 0x786   :  { %v5007_v33 = vmul.f32 -1.442695, %v3615_v31 }
 0x788   :  { %5940 = vpow2.f32 %v5007_v33 }
 0x789   :  { %5942 = vtanh.f32 %v3615_v31  ;;  %v4088_v31 = vpack.c.bf16 %v4082_v26, %v4081_v27 }
 0x795   :  { %v5941_v34 = vpop.eup %5940 }
 0x796   :  { %v3620_v35 = vadd.f32 1.0, %v5941_v34  ;;  %v5943_v36 = vpop.eup %5942 }
 0x798   :  { %5944 = vrcp.f32 %v3620_v35  ;;  %v6052_v35 = vmov 1966171168  }
 0x7a5   :  { %v5945_v37 = vpop.eup %5944 }
 0x7a6   :  { %v3623_v38 = vsel %vm6353_vm4, %v5943_v36, %v5945_v37  ;;  %v4194_v36 = vunpack.c.l.s4 %v6052_v35  ;;  %v3863_v37 = vadd.f32 %v6348_v39, %v6272_v30 }
 0x7a7   :  { %3626 = vrot.lane.b32.xlu1 %v3623_v38, %s6047_s24  ;;  %v3624_v44 = vmul.f32 %v3623_v38, %v3527_v23 }
 0x819   :  { %v3627_v41 = vpop.permute.xlu1 %3626 }
 0x81a   :  { %v3629_v42 = vmul.f32 %v3627_v41, %v3623_v38 }
 0x81c   :  { %3631 = vrot.lane.b32.xlu0 %v3629_v42, %s6051_s15 }
 0x88e   :  { %v3632_v43 = vpop.permute.xlu0 %3631 }
 0x88f   :  { %v3634_v45 = vadd.f32 %v3632_v43, %v3624_v44  ;;  %v4195_v44 = vunpack.c.0.s8 %v4194_v36  ;;  %v4197_v43 = vshrl.u32 %v3316_v49, 7 }
 0x891   :  { %5946 = vtanh.f32 %v3634_v45 }
 0x89e   :  { %v5947_v46 = vpop.eup %5946 }
 0x89f   :  { %3637 = vrot.lane.b32.xlu1 %v5947_v46, %s6047_s24  ;;  %v6464_v46 = vld [vmem:[%s6720_s7] ss:$0 sm:$0xff] }
 0x911   :  { %v3638_v47 = vpop.permute.xlu1 %3637 }
 0x912   :  { %v3640_v48 = vmul.f32 %v3638_v47, %v3623_v38  ;;  %v6466_v47 = vsub.s32 %v4195_v44, %v4197_v43 }
 0x914   :  { %3642 = vrot.lane.b32.xlu0 %v3640_v48, %s6051_s15 }
 0x986   :  { %v3643_v50 = vpop.permute.xlu0 %3642 }
 0x987   :  { %3646 = vst.msk [vmem:[#allocation3 + $0x10] sm:$0xff] %vm72_vm1, %v3643_v50  ;;  %5563 = vmatmul.mubr.msk.f32.vlgmr.msra.gmra.mxu0 %vm72_vm1, %v3643_v50 }
 0x988   :  { %5577 = vmatpush3.msra.mxu0 %v6295_v63  ;;  %5584 = vmatprep.mubr.msk.f32.mxu0 %vm6050_vm0, %v6049_v0 }
 0x989   :  { %5578 = vmatprep.subr.mxu0 %v6049_v0 }
 0x98a   :  { %5579 = vmatpush3.msra.mxu0 %v6303_v3 }
 0x98b   :  { %5580 = vmatprep.subr.mxu0 %v6049_v0 }
 0x98c   :  { %5581 = vmatpush3.msra.mxu0 %v6311_v6 }
 0x98d   :  { %5582 = vmatprep.subr.mxu0 %v6049_v0 }
 0x98e   :  { %5583 = vmatpush3.msra.mxu0 %v6320_v9  ;;  %v4083_v33 = vld [vmem:[#allocation3 + $0x10] sm:$0xff] }
 0x98f   :  { %5598 = vmatprep.subr.bf16.mxu0 %v5922_v22 }
 0xa47   :  { %v3718_v53 = vpop.f32.mrf.mxu0 }
 0xa48   :  { %v3722_v40 = vadd.f32 %v3718_v53, %v3649_v52 }
 0xa49   :  { %v5564_v54 = vpop.f32.mrf.mxu0 }
 0xa4a   :  { %v5009_v56 = vmul.f32 -1.442695, %v3722_v40 }
 0xa4c   :  { %5948 = vpow2.f32 %v5009_v56 }
 0xa4d   :  { %5950 = vtanh.f32 %v3722_v40 }
 0xa59   :  { %v5949_v57 = vpop.eup %5948 }
 0xa5a   :  { %v3727_v58 = vadd.f32 1.0, %v5949_v57  ;;  %v5951_v59 = vpop.eup %5950 }
 0xa5c   :  { %5952 = vrcp.f32 %v3727_v58 }
 0xa69   :  { %v5953_v60 = vpop.eup %5952 }
 0xa6a   :  { %v3730_v62 = vsel %vm6353_vm4, %v5951_v59, %v5953_v60 }
 0xa6b   :  { %3733 = vrot.lane.b32.xlu1 %v3730_v62, %s6047_s24  ;;  %v3731_v13 = vmul.f32 %v3730_v62, %v3634_v45 }
 0xadd   :  { %v3734_v1 = vpop.permute.xlu1 %3733 }
 0xade   :  { %v3736_v2 = vmul.f32 %v3734_v1, %v3730_v62 }
 0xae0   :  { %3738 = vrot.lane.b32.xlu0 %v3736_v2, %s6051_s15 }
 0xb52   :  { %v3739_v4 = vpop.permute.xlu0 %3738 }
 0xb53   :  { %v3741_v5 = vadd.f32 %v3739_v4, %v3731_v13 }
 0xb55   :  { %5954 = vtanh.f32 %v3741_v5 }
 0xb62   :  { %v5955_v7 = vpop.eup %5954 }
 0xb63   :  { %3744 = vrot.lane.b32.xlu1 %v5955_v7, %s6047_s24 }
 0xbd5   :  { %v3745_v8 = vpop.permute.xlu1 %3744 }
 0xbd6   :  { %v3747_v10 = vmul.f32 %v3745_v8, %v3730_v62 }
 0xbd8   :  { %3749 = vrot.lane.b32.xlu0 %v3747_v10, %s6051_s15 }
 0xc4a   :  { %v3750_v11 = vpop.permute.xlu0 %3749 }
 0xc4b   :  { %3753 = vst.msk [vmem:[#allocation3 + $0x18] sm:$0xff] %vm72_vm1, %v3750_v11  ;;  %5574 = vmatmul.mubr.msk.f32.vlgmr.msra.gmra.mxu1 %vm72_vm1, %v3750_v11 }
 0xc4c   :  { %5588 = vmatpush3.msra.mxu1 %v6295_v63  ;;  %5595 = vmatprep.mubr.msk.f32.mxu1 %vm6050_vm0, %v6049_v0 }
 0xc4d   :  { %5589 = vmatprep.subr.mxu1 %v6049_v0 }
 0xc4e   :  { %5590 = vmatpush3.msra.mxu1 %v6303_v3 }
 0xc4f   :  { %5591 = vmatprep.subr.mxu1 %v6049_v0 }
 0xc50   :  { %5592 = vmatpush3.msra.mxu1 %v6311_v6 }
 0xc51   :  { %5593 = vmatprep.subr.mxu1 %v6049_v0 }
 0xc52   :  { %5594 = vmatpush3.msra.mxu1 %v6320_v9  ;;  %v4084_v32 = vld [vmem:[#allocation3 + $0x18] sm:$0xff] }
 0xc53   :  { %v4089_v34 = vpack.c.bf16 %v4084_v32, %v4083_v33 }
 0xd0b   :  { %v3825_v14 = vpop.f32.mrf.mxu1 }
 0xd0c   :  { %v3829_v63 = vadd.f32 %v3825_v14, %v3756_v12 }
 0xd0d   :  { %v5575_v15 = vpop.f32.mrf.mxu1 }
 0xd0e   :  { %v5011_v16 = vmul.f32 -1.442695, %v3829_v63 }
 0xd10   :  { %5956 = vpow2.f32 %v5011_v16 }
 0xd11   :  { %5958 = vtanh.f32 %v3829_v63 }
 0xd1d   :  { %v5957_v17 = vpop.eup %5956 }
 0xd1e   :  { %v3834_v19 = vadd.f32 1.0, %v5957_v17  ;;  %v5959_v3 = vpop.eup %5958 }
 0xd20   :  { %5960 = vrcp.f32 %v3834_v19 }
 0xd2d   :  { %v5961_v20 = vpop.eup %5960 }
 0xd2e   :  { %v3837_v6 = vsel %vm6353_vm4, %v5959_v3, %v5961_v20 }
 0xd2f   :  { %3840 = vrot.lane.b32.xlu1 %v3837_v6, %s6047_s24  ;;  %v3838_v61 = vmul.f32 %v3837_v6, %v3741_v5 }
 0xda1   :  { %v3841_v0 = vpop.permute.xlu1 %3840 }
 0xda2   :  { %v3843_v9 = vmul.f32 %v3841_v0, %v3837_v6 }
 0xda4   :  { %3845 = vrot.lane.b32.xlu0 %v3843_v9, %s6051_s15 }
 0xe16   :  { %v3846_v21 = vpop.permute.xlu0 %3845 }
 0xe17   :  { %v6443_v55 = vadd.f32 %v3846_v21, %v3838_v61 }
 0xe19   :  { %5962 = vtanh.f32 %v6443_v55 }
 0xe26   :  { %v5963_v23 = vpop.eup %5962 }
 0xe27   :  { %3851 = vrot.lane.b32.xlu1 %v5963_v23, %s6047_s24 }
 0xe99   :  { %v3852_v24 = vpop.permute.xlu1 %3851 }
 0xe9a   :  { %v3854_v25 = vmul.f32 %v3852_v24, %v3837_v6 }
 0xe9c   :  { %3856 = vrot.lane.b32.xlu0 %v3854_v25, %s6051_s15 }
 0xf0e   :  { %v3857_v29 = vpop.permute.xlu0 %3856 }
 0xf0f   :  { %3860 = vst.msk [vmem:[#allocation3 + $0x20] sm:$0xff] %vm72_vm1, %v3857_v29  ;;  %5585 = vmatmul.mubr.msk.f32.vlgmr.msra.gmra.mxu0 %vm72_vm1, %v3857_v29 }
 0xf10   :  { %5599 = vmatpush3.bf16.msra.mxu0 %v5922_v22  ;;  %5602 = vmatprep.mubr.msk.bf16.mxu0 %vm72_vm1, %v4088_v31 }
 0xf11   :  { %5600 = vmatprep.subr.bf16.mxu0 %v5923_v28 }
 0xf14   :  { %5601 = vmatpush3.bf16.msra.mxu0 %v5923_v28 }
 0xf17   :  { %5603 = vmatmul.mubr.msk.bf16.vlgmr.msra.gmra.mxu0 %vm72_vm1, %v4089_v34 }
 0xfcf   :  { %v3932_v38 = vpop.f32.mrf.mxu0 }
 0xfd0   :  { %v3936_v41 = vadd.f32 %v3932_v38, %v3863_v37 }
 0xfd1   :  { %v5586_v42 = vpop.f32.mrf.mxu0 }
 0xfd2   :  { %v5013_v45 = vmul.f32 -1.442695, %v3936_v41 }
 0xfd4   :  { %5964 = vpow2.f32 %v5013_v45 }
 0xfd5   :  { %5966 = vtanh.f32 %v3936_v41 }
 0xfd7   :  { %v5604_v48 = vpop.f32.mrf.mxu0 }
 0xfd8   :  { %v4170_v50 = vadd.f32 %v5604_v48, %v6464_v46 }
 0xfd9   :  { %v4161_v52 = vpop.f32.mrf.mxu0 }
 0xfda   :  { %v4324_v30 = vcombine.high %v4170_v50, %v4170_v50  ;;  %v4331_v53 = vrot.slane %v4170_v50, %v6466_v47  ;;  %v4162_v40 = vadd.f32 %v6464_v46, %v4161_v52 }
 0xfdb   :  { %v5605_v54 = vpop.f32.mrf.mxu0 }
 0xfdc   :  { %v4338_v49 = vrot.slane %v4324_v30, %v6466_v47  ;;  %v4339_v56 = vcombine.high %v4331_v53, %v4331_v53  ;;  %v4347_v57 = vrot.slane %v4331_v53, %v6466_v47  ;;  %5031 = vst.sshfl [vmem:[%s6723_s10 + $0x2] sm:$0x1 pattern:$0x73625140] %v4331_v53  ;;  %v4192_v58 = vcombine.high %v4162_v40, %v4162_v40 }
 0xfdd   :  { %v4199_v59 = vrot.slane %v4162_v40, %v6466_v47  ;;  %v4173_v60 = vadd.f32 %v5605_v54, %v6464_v46  ;;  %v4164_v9 = vpop.f32.mrf.mxu0 }
 0xfde   :  { %v4340_v62 = vcombine.high %v4338_v49, %v4338_v49  ;;  %v4354_v1 = vrot.slane %v4338_v49, %v6466_v47  ;;  %v4361_v2 = vrot.slane %v4339_v56, %v6466_v47  ;;  %v4369_v13 = vcombine.high %v4347_v57, %v4347_v57  ;;  %5032 = vst.sshfl [vmem:[%s6723_s10 + $0xa] sm:$0x1 pattern:$0x73625140] %v4339_v56 }
 0xfdf   :  { %5033 = vst.sshfl [vmem:[%s6723_s10 + $0x22] sm:$0x1 pattern:$0x73625140] %v4338_v49  ;;  %v4206_v4 = vrot.slane %v4192_v58, %v6466_v47  ;;  %v4207_v5 = vcombine.high %v4199_v59, %v4199_v59  ;;  %v4215_v7 = vrot.slane %v4199_v59, %v6466_v47  ;;  %v4390_v8 = vcombine.high %v4173_v60, %v4173_v60 }
 0xfe0   :  { %5023 = vst.sshfl [vmem:[%s6723_s10] sm:$0x1 pattern:$0x73625140] %v4199_v59  ;;  %v4368_v10 = vrot.slane %v4340_v62, %v6466_v47  ;;  %v4370_v11 = vcombine.high %v4354_v1, %v4354_v1  ;;  %v4371_v12 = vcombine.high %v4361_v2, %v4361_v2  ;;  %4383 = vst [vmem:[%s6723_s10 + $0x12] sm:$0x1] %v4369_v13  ;;  %v4085_v13 = vld [vmem:[#allocation3 + $0x20] sm:$0xff] }
 0xfe1   :  { %5034 = vst.sshfl [vmem:[%s6723_s10 + $0x2a] sm:$0x1 pattern:$0x73625140] %v4340_v62  ;;  %v4397_v14 = vrot.slane %v4173_v60, %v6466_v47  ;;  %v5965_v63 = vpop.eup %5964  ;;  %v4208_v15 = vcombine.high %v4206_v4, %v4206_v4  ;;  %v4222_v16 = vrot.slane %v4206_v4, %v6466_v47  ;;  %v4229_v17 = vrot.slane %v4207_v5, %v6466_v47 }
 0xfe2   :  { %v4237_v19 = vcombine.high %v4215_v7, %v4215_v7  ;;  %5024 = vst.sshfl [vmem:[%s6723_s10 + $0x8] sm:$0x1 pattern:$0x73625140] %v4207_v5  ;;  %v3941_v3 = vadd.f32 1.0, %v5965_v63  ;;  %v4372_v20 = vcombine.high %v4368_v10, %v4368_v10  ;;  %v4404_v6 = vrot.slane %v4390_v8, %v6466_v47  ;;  %v5967_v42 = vpop.eup %5966 }
 0xfe3   :  { %5025 = vst.sshfl [vmem:[%s6723_s10 + $0x20] sm:$0x1 pattern:$0x73625140] %v4206_v4  ;;  %4384 = vst [vmem:[%s6723_s10 + $0x1a] sm:$0x1] %v4371_v12  ;;  %v4405_v0 = vcombine.high %v4397_v14, %v4397_v14  ;;  %v4236_v61 = vrot.slane %v4208_v15, %v6466_v47  ;;  %v4238_v21 = vcombine.high %v4222_v16, %v4222_v16 }
 0xfe4   :  { %4387 = vst [vmem:[%s6723_s10 + $0x32] sm:$0x1] %v4370_v11  ;;  %5035 = vst.sshfl [vmem:[%s6723_s10 + $0x3] sm:$0x1 pattern:$0x73625140] %v4397_v14  ;;  %v4239_v22 = vcombine.high %v4229_v17, %v4229_v17  ;;  %v4413_v23 = vrot.slane %v4397_v14, %v6466_v47  ;;  %5968 = vrcp.f32 %v3941_v3  ;;  %v4406_v24 = vcombine.high %v4404_v6, %v4404_v6 }
 0xfe5   :  { %4251 = vst [vmem:[%s6723_s10 + $0x10] sm:$0x1] %v4237_v19  ;;  %5026 = vst.sshfl [vmem:[%s6723_s10 + $0x28] sm:$0x1 pattern:$0x73625140] %v4208_v15  ;;  %v4420_v25 = vrot.slane %v4404_v6, %v6466_v47  ;;  %v4427_v26 = vrot.slane %v4405_v0, %v6466_v47  ;;  %v4240_v27 = vcombine.high %v4236_v61, %v4236_v61 }
 0xfe6   :  { %4388 = vst [vmem:[%s6723_s10 + $0x3a] sm:$0x1] %v4372_v20  ;;  %5036 = vst.sshfl [vmem:[%s6723_s10 + $0xb] sm:$0x1 pattern:$0x73625140] %v4405_v0  ;;  %v4435_v28 = vcombine.high %v4413_v23, %v4413_v23  ;;  %v4165_v29 = vadd.f32 %v6464_v46, %v4164_v9  ;;  %v4434_v31 = vrot.slane %v4406_v24, %v6466_v47 }
 0xfe7   :  { %5037 = vst.sshfl [vmem:[%s6723_s10 + $0x23] sm:$0x1 pattern:$0x73625140] %v4404_v6  ;;  %4252 = vst [vmem:[%s6723_s10 + $0x18] sm:$0x1] %v4239_v22  ;;  %v4436_v32 = vcombine.high %v4420_v25, %v4420_v25  ;;  %v4437_v33 = vcombine.high %v4427_v26, %v4427_v26 }
 0xfe8   :  { %4255 = vst [vmem:[%s6723_s10 + $0x30] sm:$0x1] %v4238_v21  ;;  %5038 = vst.sshfl [vmem:[%s6723_s10 + $0x2b] sm:$0x1 pattern:$0x73625140] %v4406_v24  ;;  %v4258_v34 = vcombine.high %v4165_v29, %v4165_v29  ;;  %v4265_v35 = vrot.slane %v4165_v29, %v6466_v47  ;;  %v4438_v36 = vcombine.high %v4434_v31, %v4434_v31 }
 0xfe9   :  { %4256 = vst [vmem:[%s6723_s10 + $0x38] sm:$0x1] %v4240_v27  ;;  %4449 = vst [vmem:[%s6723_s10 + $0x13] sm:$0x1] %v4435_v28 }
 0xfea   :  { %4450 = vst [vmem:[%s6723_s10 + $0x1b] sm:$0x1] %v4437_v33  ;;  %4453 = vst [vmem:[%s6723_s10 + $0x33] sm:$0x1] %v4436_v32  ;;  %v4272_v37 = vrot.slane %v4258_v34, %v6466_v47  ;;  %v4273_v38 = vcombine.high %v4265_v35, %v4265_v35  ;;  %v4281_v41 = vrot.slane %v4265_v35, %v6466_v47 }
 0xfeb   :  { %5027 = vst.sshfl [vmem:[%s6723_s10 + $0x1] sm:$0x1 pattern:$0x73625140] %v4265_v35  ;;  %4454 = vst [vmem:[%s6723_s10 + $0x3b] sm:$0x1] %v4438_v36 }
 0xfec   :  { %v4274_v44 = vcombine.high %v4272_v37, %v4272_v37  ;;  %v4288_v43 = vrot.slane %v4272_v37, %v6466_v47  ;;  %v4295_v45 = vrot.slane %v4273_v38, %v6466_v47  ;;  %v4303_v48 = vcombine.high %v4281_v41, %v4281_v41  ;;  %5028 = vst.sshfl [vmem:[%s6723_s10 + $0x9] sm:$0x1 pattern:$0x73625140] %v4273_v38 }
 0xfed   :  { %5029 = vst.sshfl [vmem:[%s6723_s10 + $0x21] sm:$0x1 pattern:$0x73625140] %v4272_v37 }
 0xfee   :  { %v4302_v50 = vrot.slane %v4274_v44, %v6466_v47  ;;  %v4304_v52 = vcombine.high %v4288_v43, %v4288_v43  ;;  %v4305_v30 = vcombine.high %v4295_v45, %v4295_v45  ;;  %4317 = vst [vmem:[%s6723_s10 + $0x11] sm:$0x1] %v4303_v48  ;;  %5030 = vst.sshfl [vmem:[%s6723_s10 + $0x29] sm:$0x1 pattern:$0x73625140] %v4274_v44 }
 0xff0   :  { %v4306_v53 = vcombine.high %v4302_v50, %v4302_v50  ;;  %4318 = vst [vmem:[%s6723_s10 + $0x19] sm:$0x1] %v4305_v30  ;;  %4321 = vst [vmem:[%s6723_s10 + $0x31] sm:$0x1] %v4304_v52 }
 0xff1   :  { %v5969_v40 = vpop.eup %5968 }
 0xff2   :  { %4322 = vst [vmem:[%s6723_s10 + $0x39] sm:$0x1] %v4306_v53  ;;  %v3944_v54 = vsel %vm6353_vm4, %v5967_v42, %v5969_v40 }
 0xff3   :  { %3947 = vrot.lane.b32.xlu1 %v3944_v54, %s6047_s24  ;;  %v3945_v57 = vmul.f32 %v3944_v54, %v6443_v55  ;;  %v3970_v55 = vadd.f32 %v6348_v39, %v6270_v18 }
0x1065   :  { %v3948_v49 = vpop.permute.xlu1 %3947 }
0x1066   :  { %v3950_v56 = vmul.f32 %v3948_v49, %v3944_v54 }
0x1068   :  { %3952 = vrot.lane.b32.xlu0 %v3950_v56, %s6051_s15 }
0x10da   :  { %v3953_v58 = vpop.permute.xlu0 %3952 }
0x10db   :  { %v3955_v59 = vadd.f32 %v3953_v58, %v3945_v57 }
0x10dd   :  { %5970 = vtanh.f32 %v3955_v59 }
0x10ea   :  { %v5971_v60 = vpop.eup %5970 }
0x10eb   :  { %3958 = vrot.lane.b32.xlu1 %v5971_v60, %s6047_s24 }
0x115d   :  { %v3959_v62 = vpop.permute.xlu1 %3958 }
0x115e   :  { %v3961_v1 = vmul.f32 %v3959_v62, %v3944_v54 }
0x1160   :  { %3963 = vrot.lane.b32.xlu0 %v3961_v1, %s6051_s15 }
0x11d2   :  { %v3964_v2 = vpop.permute.xlu0 %3963 }
0x11d3   :  { %3967 = vst.msk [vmem:[#allocation3 + $0x28] sm:$0xff] %vm72_vm1, %v3964_v2  ;;  %5596 = vmatmul.mubr.msk.f32.vlgmr.msra.gmra.mxu1 %vm72_vm1, %v3964_v2 }
0x11da   :  { %v4086_v4 = vld [vmem:[#allocation3 + $0x28] sm:$0xff] }
0x11db   :  { %v4090_v5 = vpack.c.bf16 %v4086_v4, %v4085_v13 }
0x11dd   :  { %5606 = vmatprep.mubr.msk.bf16.mxu0 %vm72_vm1, %v4090_v5 }
0x1293   :  { %v4039_v7 = vpop.f32.mrf.mxu1 }
0x1294   :  { %v4043_v8 = vadd.f32 %v4039_v7, %v3970_v55 }
0x1295   :  { %v5597_v10 = vpop.f32.mrf.mxu1 }
0x1296   :  { %v5015_v11 = vmul.f32 -1.442695, %v4043_v8 }
0x1298   :  { %5972 = vpow2.f32 %v5015_v11 }
0x1299   :  { %5974 = vtanh.f32 %v4043_v8 }
0x12a5   :  { %v5973_v12 = vpop.eup %5972 }
0x12a6   :  { %v4048_v14 = vadd.f32 1.0, %v5973_v12  ;;  %v5975_v63 = vpop.eup %5974 }
0x12a8   :  { %5976 = vrcp.f32 %v4048_v14 }
0x12b5   :  { %v5977_v15 = vpop.eup %5976 }
0x12b6   :  { %v4051_v16 = vsel %vm6353_vm4, %v5975_v63, %v5977_v15 }
0x12b7   :  { %4054 = vrot.lane.b32.xlu1 %v4051_v16, %s6047_s24  ;;  %v4052_v18 = vmul.f32 %v4051_v16, %v3955_v59 }
0x1329   :  { %v4055_v17 = vpop.permute.xlu1 %4054 }
0x132a   :  { %v4057_v19 = vmul.f32 %v4055_v17, %v4051_v16 }
0x132c   :  { %4059 = vrot.lane.b32.xlu0 %v4057_v19, %s6051_s15 }
0x139e   :  { %v4060_v39 = vpop.permute.xlu0 %4059 }
0x139f   :  { %v4062_v3 = vadd.f32 %v4060_v39, %v4052_v18 }
0x13a1   :  { %5978 = vtanh.f32 %v4062_v3 }
0x13ae   :  { %v5979_v20 = vpop.eup %5978 }
0x13af   :  { %4065 = vrot.lane.b32.xlu1 %v5979_v20, %s6047_s24  ;;  %s4661_s24 = sshll.u32 %s6054_s3, 4  ;;  %s4662_s24 = int_to_ptr.vmem [resolvable:$true] %s4661_s24 }
0x13b0   :  { %s6000_s4 = scalar_lea.vmem %s4662_s24, 128  ;;  %p6005_p6 = scmp.lt.s32.totalorder %s4662_s24, %s4662_s24 }
0x13b1   :  { %p6001_p5 = scmp.ne.s32.totalorder %s4662_s24, %s6000_s4  ;;  %p6006_p7 = scmp.lt.s32.totalorder %s6000_s4, %s6000_s4 }
0x13b3   :  { %4077 = vrot.lane.b32.xlu1 %v4062_v3, %s6053_s30  ;;  %p6007_p8 = por %p6006_p7, %p6005_p6 }
0x13b5   :  { %p6008_p9 = pnand %p6007_p8, %p6001_p5 }
0x1421   :  { %v4066_v6 = vpop.permute.xlu1 %4065 }
0x1422   :  { %v4068_v0 = vmul.f32 %v4066_v6, %v4051_v16 }
0x1424   :  { %4070 = vrot.lane.b32.xlu0 %v4068_v0, %s6051_s15 }
0x1425   :  { %v4078_v51 = vpop.permute.xlu1 %4077 }
0x1426   :  { %4080 = vst.msk [vmem:[#allocation8] sm:$0xff] %vm72_vm1, %v4078_v51 }
0x1496   :  { %v4071_v9 = vpop.permute.xlu0 %4070 }
0x1497   :  { %4074 = vst.msk [vmem:[#allocation3 + $0x30] sm:$0xff] %vm72_vm1, %v4071_v9  ;;  %4075 = vst.msk [vmem:[#allocation7] sm:$0xff] %vm72_vm1, %v4071_v9 }
0x149e   :  { %v4087_v61 = vld [vmem:[#allocation3 + $0x30] sm:$0xff] }
0x149f   :  { %v4091_v21 = vpack.c.bf16 %v4087_v61, %v4087_v61 }
0x14a1   :  { %5607 = vmatmul.mubr.msk.bf16.gmra.mxu0 %vm72_vm1, %v4091_v21 }
0x14a2   :  { %6011 = shalt.err (!%p6008_p9)
}
0x14a3   :  { %4664 = dma.vmem_to_hbm [thread:$0]  %s4662_s24, 128, %s6724_s11, [#allocation6]  }
0x14a4   :  { %s6020_s8 = scalar_lea.vmem %s4672_s14, 128  ;;  %p6025_p11 = scmp.lt.s32.totalorder %s4672_s14, %s4672_s14 }
0x14a5   :  { %p6021_p10 = scmp.ne.s32.totalorder %s4672_s14, %s6020_s8  ;;  %p6026_p12 = scmp.lt.s32.totalorder %s6020_s8, %s6020_s8 }
0x14a7   :  { %p6027_p13 = por %p6026_p12, %p6025_p11 }
0x14a9   :  { %p6028_p0 = pnand %p6027_p13, %p6021_p10 }
0x14ab   :  { %6031 = shalt.err (!%p6028_p0)
}
0x14ac   :  { %4674 = dma.vmem_to_hbm [thread:$0]  %s4672_s14, 128, %s6725_s12, [#allocation9]  }
0x1561   :  { %v5608_v22 = vpop.f32.mrf.mxu0 }
0x1562   :  { %v4186_v23 = vadd.f32 %v5608_v22, %v6464_v46 }
0x1563   :  { %v4177_v24 = vpop.f32.mrf.mxu0 }
0x1564   :  { %v4588_v25 = vcombine.high %v4186_v23, %v4186_v23  ;;  %v4595_v26 = vrot.slane %v4186_v23, %v6466_v47  ;;  %v4178_v27 = vadd.f32 %v6464_v46, %v4177_v24 }
0x1565   :  { %v5609_v28 = vpop.f32.mrf.mxu0 }
0x1566   :  { %v4602_v29 = vrot.slane %v4588_v25, %v6466_v47  ;;  %v4603_v31 = vcombine.high %v4595_v26, %v4595_v26  ;;  %v4611_v32 = vrot.slane %v4595_v26, %v6466_v47  ;;  %5047 = vst.sshfl [vmem:[%s6723_s10 + $0x6] sm:$0x1 pattern:$0x73625140] %v4595_v26  ;;  %v4456_v33 = vcombine.high %v4178_v27, %v4178_v27 }
0x1567   :  { %v4463_v34 = vrot.slane %v4178_v27, %v6466_v47  ;;  %v4180_v35 = vpop.f32.mrf.mxu0 }
0x1568   :  { %v4604_v36 = vcombine.high %v4602_v29, %v4602_v29  ;;  %v4618_v37 = vrot.slane %v4602_v29, %v6466_v47  ;;  %v4625_v38 = vrot.slane %v4603_v31, %v6466_v47  ;;  %v4633_v41 = vcombine.high %v4611_v32, %v4611_v32  ;;  %5048 = vst.sshfl [vmem:[%s6723_s10 + $0xe] sm:$0x1 pattern:$0x73625140] %v4603_v31 }
0x1569   :  { %5049 = vst.sshfl [vmem:[%s6723_s10 + $0x26] sm:$0x1 pattern:$0x73625140] %v4602_v29  ;;  %v4470_v42 = vrot.slane %v4456_v33, %v6466_v47  ;;  %v4471_v44 = vcombine.high %v4463_v34, %v4463_v34  ;;  %v4479_v43 = vrot.slane %v4463_v34, %v6466_v47  ;;  %v4181_v45 = vadd.f32 %v6464_v46, %v4180_v35 }
0x156a   :  { %5039 = vst.sshfl [vmem:[%s6723_s10 + $0x4] sm:$0x1 pattern:$0x73625140] %v4463_v34  ;;  %v4632_v48 = vrot.slane %v4604_v36, %v6466_v47  ;;  %v4634_v50 = vcombine.high %v4618_v37, %v4618_v37  ;;  %v4635_v52 = vcombine.high %v4625_v38, %v4625_v38  ;;  %4647 = vst [vmem:[%s6723_s10 + $0x16] sm:$0x1] %v4633_v41 }
0x156b   :  { %5050 = vst.sshfl [vmem:[%s6723_s10 + $0x2e] sm:$0x1 pattern:$0x73625140] %v4604_v36  ;;  %v4472_v30 = vcombine.high %v4470_v42, %v4470_v42  ;;  %v4486_v53 = vrot.slane %v4470_v42, %v6466_v47  ;;  %v4493_v40 = vrot.slane %v4471_v44, %v6466_v47  ;;  %v4501_v54 = vcombine.high %v4479_v43, %v4479_v43 }
0x156c   :  { %5040 = vst.sshfl [vmem:[%s6723_s10 + $0xc] sm:$0x1 pattern:$0x73625140] %v4471_v44  ;;  %v4636_v46 = vcombine.high %v4632_v48, %v4632_v48  ;;  %4648 = vst [vmem:[%s6723_s10 + $0x1e] sm:$0x1] %v4635_v52  ;;  %v4522_v49 = vcombine.high %v4181_v45, %v4181_v45  ;;  %v4529_v56 = vrot.slane %v4181_v45, %v6466_v47 }
0x156d   :  { %5041 = vst.sshfl [vmem:[%s6723_s10 + $0x24] sm:$0x1 pattern:$0x73625140] %v4470_v42  ;;  %4651 = vst [vmem:[%s6723_s10 + $0x36] sm:$0x1] %v4634_v50  ;;  %v4500_v57 = vrot.slane %v4472_v30, %v6466_v47  ;;  %v4502_v58 = vcombine.high %v4486_v53, %v4486_v53  ;;  %v4503_v59 = vcombine.high %v4493_v40, %v4493_v40 }
0x156e   :  { %4515 = vst [vmem:[%s6723_s10 + $0x14] sm:$0x1] %v4501_v54  ;;  %5042 = vst.sshfl [vmem:[%s6723_s10 + $0x2c] sm:$0x1 pattern:$0x73625140] %v4472_v30  ;;  %v4536_v60 = vrot.slane %v4522_v49, %v6466_v47  ;;  %v4537_v62 = vcombine.high %v4529_v56, %v4529_v56  ;;  %v4545_v1 = vrot.slane %v4529_v56, %v6466_v47 }
0x156f   :  { %4652 = vst [vmem:[%s6723_s10 + $0x3e] sm:$0x1] %v4636_v46  ;;  %5043 = vst.sshfl [vmem:[%s6723_s10 + $0x5] sm:$0x1 pattern:$0x73625140] %v4529_v56  ;;  %v4504_v2 = vcombine.high %v4500_v57, %v4500_v57 }
0x1570   :  { %4516 = vst [vmem:[%s6723_s10 + $0x1c] sm:$0x1] %v4503_v59  ;;  %4519 = vst [vmem:[%s6723_s10 + $0x34] sm:$0x1] %v4502_v58  ;;  %v4538_v13 = vcombine.high %v4536_v60, %v4536_v60  ;;  %v4552_v4 = vrot.slane %v4536_v60, %v6466_v47  ;;  %v4559_v5 = vrot.slane %v4537_v62, %v6466_v47 }
0x1571   :  { %v4567_v55 = vcombine.high %v4545_v1, %v4545_v1  ;;  %5044 = vst.sshfl [vmem:[%s6723_s10 + $0xd] sm:$0x1 pattern:$0x73625140] %v4537_v62  ;;  %4520 = vst [vmem:[%s6723_s10 + $0x3c] sm:$0x1] %v4504_v2 }
0x1572   :  { %5045 = vst.sshfl [vmem:[%s6723_s10 + $0x25] sm:$0x1 pattern:$0x73625140] %v4536_v60  ;;  %v4566_v7 = vrot.slane %v4538_v13, %v6466_v47  ;;  %v4568_v8 = vcombine.high %v4552_v4, %v4552_v4  ;;  %v4569_v10 = vcombine.high %v4559_v5, %v4559_v5 }
0x1573   :  { %4581 = vst [vmem:[%s6723_s10 + $0x15] sm:$0x1] %v4567_v55  ;;  %5046 = vst.sshfl [vmem:[%s6723_s10 + $0x2d] sm:$0x1 pattern:$0x73625140] %v4538_v13 }
0x1574   :  { %v4570_v11 = vcombine.high %v4566_v7, %v4566_v7  ;;  %4582 = vst [vmem:[%s6723_s10 + $0x1d] sm:$0x1] %v4569_v10  ;;  %4585 = vst [vmem:[%s6723_s10 + $0x35] sm:$0x1] %v4568_v8 }
0x1576   :  { %4586 = vst [vmem:[%s6723_s10 + $0x3d] sm:$0x1] %v4570_v11 }
0x1577   :  { %6042 = dma.done.wait [#allocation6], 128  }
0x1578   :  { %6043 = vsyncadd [#allocation6], 4294967168 }
0x1579   :  { %6044 = dma.done.wait [#allocation9], 128  }
0x157a   :  { %6045 = vsyncadd [#allocation9], 4294967168 }
0x157b   :  { %4683 = vsyncpa [#allocation5], 1 }
0x157c   :  { %4684 = vsyncpa [#allocation6], 1 }
0x157d   :  { %4685 = vsyncpa [#allocation9], 1 }

</bundles_post_ra>
